<compile_context>
chip_gen: v6e
topology: v6e:2x2x1
jax: 0.10.0
libtpu: 0.0.40
codegen_flags: <defaults>
</compile_context>

<pallas_src>
import math
from functools import partial

import jax
import jax.numpy as jnp
from jax.experimental import pallas as pl
from jax.experimental.pallas import tpu as pltpu


# --------------------------------------------------------------------------
# Kernel: full transformer forward for one batch element.
# --------------------------------------------------------------------------
def _transformer_kernel(x_ref, pe_ref, mask_ref,
                        wqkv_ref, bqkv_ref, wo_ref, bo_ref, attn_nw_ref,
                        w1_ref, b1_ref, w2_ref, b2_ref, ffn_nw_ref,
                        fnorm_ref, fw_ref, fb_ref,
                        out_ref, *, num_layers, num_heads, head_dim):
    # PositionalEncoding: x + pe (same PE for every batch element).
    x = x_ref[0].astype(jnp.float32) + pe_ref[...]          # (S, D)
    S, D = x.shape
    keep = mask_ref[...] != 0                                # (S, S), once
    scale = 1.0 / (head_dim ** 0.5)

    # Static (unrolled) loop over transformer blocks.
    for l in range(num_layers):
        # ---- fused QKV projection, batched over heads -----------------------
        xh = jnp.broadcast_to(x[None, :, :], (num_heads, S, D))      # (H, S, D)
        qkv = jnp.einsum("hsd,hde->hse", xh, wqkv_ref[l],
                         preferred_element_type=jnp.float32) + bqkv_ref[l]
        q = qkv[:, :, :head_dim]                                      # (H, S, dh)
        k = qkv[:, :, head_dim:2 * head_dim]
        v = qkv[:, :, 2 * head_dim:]

        # ---- attention (softmax stats in f32) --------------------------------
        scores = jnp.einsum("hqe,hke->hqk", q, k,
                            preferred_element_type=jnp.float32) * scale
        scores = jnp.where(keep[None, :, :], scores, jnp.float32(-1e9))
        scores = scores - jnp.max(scores, axis=-1, keepdims=True)
        p = jnp.exp(scores)
        p = p * pl.reciprocal(jnp.sum(p, axis=-1, keepdims=True), approx=True)

        ctx = jnp.einsum("hqk,hke->hqe", p, v,
                         preferred_element_type=jnp.float32)          # (H, S, dh)
        proj = jnp.einsum("hqe,hed->hqd", ctx, wo_ref[l],
                          preferred_element_type=jnp.float32)         # (H, S, D)
        attn = jnp.sum(proj, axis=0) + bo_ref[l]                      # (S, D)

        # ---- RMSNorm(attention) * w + residual (dropout = identity) ----------
        attn_n = attn * jax.lax.rsqrt(
            jnp.mean(attn * attn, axis=-1, keepdims=True) + 1e-6)
        h = x + attn_nw_ref[l] * attn_n

        # ---- feed-forward: Linear -> SiLU -> Linear, RMSNorm + residual ------
        f = jnp.dot(h, w1_ref[l], preferred_element_type=jnp.float32) + b1_ref[l]
        f = f * jax.nn.sigmoid(f)                                      # SiLU
        f = jnp.dot(f, w2_ref[l], preferred_element_type=jnp.float32) + b2_ref[l]
        f_n = f * jax.lax.rsqrt(jnp.mean(f * f, axis=-1, keepdims=True) + 1e-6)
        x = h + ffn_nw_ref[l] * f_n                                    # (S, D)

    # ---- final RMSNorm + output projection -----------------------------------
    yn = x * jax.lax.rsqrt(jnp.mean(x * x, axis=-1, keepdims=True) + 1e-6)
    yn = fnorm_ref[...] * yn
    out = jnp.dot(yn, fw_ref[...], preferred_element_type=jnp.float32) + fb_ref[...]
    out_ref[0] = out.astype(out_ref.dtype)


# --------------------------------------------------------------------------
# Wrappers (glue)
# --------------------------------------------------------------------------
def _rep(shape):
    """BlockSpec for a weight/constant that is fully resident, same block
    every grid step (Pallas then skips re-DMA across steps)."""
    zeros = (0,) * len(shape)
    return pl.BlockSpec(tuple(shape), lambda b, _z=zeros: _z)


def pack_params(params, num_heads):
    """Host-side repacking: per-head QKV/output-proj layout, and all per-layer
    tensors stacked along a leading layer axis so a single kernel can unroll
    over layers."""
    layers = params["layers"]
    D = layers[0]["wq"].shape[0]
    dh = D // num_heads

    def per_head_w(w):   # (D, H*dh) -> (H, D, dh)
        return jnp.transpose(w.reshape(D, num_heads, dh), (1, 0, 2))

    def per_head_b(b):   # (1, H*dh) -> (H, 1, dh)
        return jnp.transpose(b.reshape(1, num_heads, dh), (1, 0, 2))

    def stack(fn):
        return jnp.stack([fn(lp) for lp in layers], axis=0)

    return dict(
        wqkv=stack(lambda lp: jnp.concatenate(
            [per_head_w(lp["wq"]), per_head_w(lp["wk"]), per_head_w(lp["wv"])],
            axis=-1)),                                           # (L, H, D, 3dh)
        bqkv=stack(lambda lp: jnp.concatenate(
            [per_head_b(lp["bq"]), per_head_b(lp["bk"]), per_head_b(lp["bv"])],
            axis=-1)),                                           # (L, H, 1, 3dh)
        wo_h=stack(lambda lp: lp["wo"].reshape(num_heads, dh, D)),  # (L, H, dh, D)
        bo=stack(lambda lp: lp["bo"]),                              # (L, 1, D)
        attn_norm_w=stack(lambda lp: lp["attn_norm_w"]),            # (L, 1, D)
        w1=stack(lambda lp: lp["w1"]),                              # (L, D, dff)
        b1=stack(lambda lp: lp["b1"]),                              # (L, 1, dff)
        w2=stack(lambda lp: lp["w2"]),                              # (L, dff, D)
        b2=stack(lambda lp: lp["b2"]),                              # (L, 1, D)
        ffn_norm_w=stack(lambda lp: lp["ffn_norm_w"]),              # (L, 1, D)
    )


def positional_encoding(seq_len, d_model):
    position = jnp.arange(seq_len, dtype=jnp.float32)[:, None]
    div_term = jnp.exp(jnp.arange(0, d_model, 2, dtype=jnp.float32)
                       * (-math.log(10000.0) / d_model))
    pe = jnp.zeros((seq_len, d_model), jnp.float32)
    pe = pe.at[:, 0::2].set(jnp.sin(position * div_term))
    pe = pe.at[:, 1::2].set(jnp.cos(position * div_term))
    return pe


def transformer_forward(x, mask, params, num_heads):
    B, S, D = x.shape
    H, dh = num_heads, D // num_heads
    packed = pack_params(params, num_heads)
    L = packed["wqkv"].shape[0]
    d_ff = packed["w1"].shape[-1]
    Dout = params["out_w"].shape[1]

    pe = positional_encoding(S, D)                                   # (S, D)
    # TODO(synk): per-batch masks (B,1,S,S) would need a per-batch mask block.
    mask2d = jnp.broadcast_to(mask, (1, 1, S, S))[0, 0]              # (S, S)

    inputs = [x, pe, mask2d,
              packed["wqkv"], packed["bqkv"], packed["wo_h"], packed["bo"],
              packed["attn_norm_w"], packed["w1"], packed["b1"],
              packed["w2"], packed["b2"], packed["ffn_norm_w"],
              params["norm_w"], params["out_w"], params["out_b"]]
    in_specs = [pl.BlockSpec((1, S, D), lambda b: (b, 0, 0))] + \
               [_rep(a.shape) for a in inputs[1:]]

    kernel = partial(_transformer_kernel, num_layers=int(L), num_heads=H,
                     head_dim=dh)

    # Explicit VMEM budget: resident weights (+double-buffer headroom) +
    # activation blocks + in-kernel intermediates, capped at v7x's 64 MiB.
    weight_bytes = sum(int(a.size) * a.dtype.itemsize for a in inputs[1:])
    block_bytes = 2 * (S * D + S * Dout) * 4
    inter_bytes = 4 * (3 * H * S * S + 2 * H * S * (3 * dh)
                       + 2 * H * S * D + S * d_ff + 4 * S * D)
    vmem = int(min(max(2 * weight_bytes + block_bytes + inter_bytes + (2 << 20),
                       16 << 20), 64 << 20))

    return pl.pallas_call(
        kernel,
        out_shape=jax.ShapeDtypeStruct((B, S, Dout), x.dtype),
        grid=(B,),
        in_specs=in_specs,
        out_specs=pl.BlockSpec((1, S, Dout), lambda b: (b, 0, 0)),
        compiler_params=pltpu.CompilerParams(
            dimension_semantics=("parallel",),   # batch axis -> both TCs on v7x
            vmem_limit_bytes=vmem),
    )(*inputs)


# --------------------------------------------------------------------------
# Deterministic parameter init (same layout as the PyTorch reference)
# --------------------------------------------------------------------------
def init_params(key, d_model, d_ff, n_layers, output_dim):
    def dense(k, din, dout):
        kw, kb = jax.random.split(k)
        w = jax.random.normal(kw, (din, dout), jnp.float32) * 0.02
        b = jax.random.normal(kb, (1, dout), jnp.float32) * 0.02
        return w, b

    keys = jax.random.split(key, n_layers + 1)
    layers = []
    for i in range(n_layers):
        ks = jax.random.split(keys[i], 6)
        wq, bq = dense(ks[0], d_model, d_model)
        wk, bk = dense(ks[1], d_model, d_model)
        wv, bv = dense(ks[2], d_model, d_model)
        wo, bo = dense(ks[3], d_model, d_model)
        w1, b1 = dense(ks[4], d_model, d_ff)
        w2, b2 = dense(ks[5], d_ff, d_model)
        layers.append(dict(
            wq=wq, bq=bq, wk=wk, bk=bk, wv=wv, bv=bv, wo=wo, bo=bo,
            w1=w1, b1=b1, w2=w2, b2=b2,
            attn_norm_w=jnp.ones((1, d_model), jnp.float32),
            ffn_norm_w=jnp.ones((1, d_model), jnp.float32),
        ))
    out_w, out_b = dense(keys[-1], d_model, output_dim)
    return dict(layers=layers,
                norm_w=jnp.ones((1, d_model), jnp.float32),
                out_w=out_w, out_b=out_b)


# --------------------------------------------------------------------------
if __name__ == "__main__":
    B, S = 2, 8
    d_model, n_heads, d_ff, n_layers, output_dim = 32, 4, 64, 2, 16

    key = jax.random.PRNGKey(0)
    kx, kp = jax.random.split(key)
    x = jax.random.normal(kx, (B, S, d_model), jnp.float32)
    # broadcastable (1, 1, S, S) causal mask; positions where mask==0 get -1e9
    mask = jnp.tril(jnp.ones((S, S), jnp.float32))[None, None, :, :]

    params = init_params(kp, d_model, d_ff, n_layers, output_dim)

    fwd = jax.jit(partial(transformer_forward, num_heads=n_heads))
    out = fwd(x, mask, params)
    out = jax.block_until_ready(out)

    assert out.shape == (B, S, output_dim), out.shape
    assert bool(jnp.all(jnp.isfinite(out)))
    print("KERNEL_OK")
</pallas_src>

<mosaic_0001>
module attributes {stable_mosaic.version = 11 : i64} {
  func.func @_transformer_kernel(%arg0: i32, %arg1: memref<1x8x32xf32, #tpu.memory_space<vmem>>, %arg2: memref<8x32xf32, #tpu.memory_space<vmem>>, %arg3: memref<8x8xf32, #tpu.memory_space<vmem>>, %arg4: memref<2x4x32x24xf32, #tpu.memory_space<vmem>>, %arg5: memref<2x4x1x24xf32, #tpu.memory_space<vmem>>, %arg6: memref<2x4x8x32xf32, #tpu.memory_space<vmem>>, %arg7: memref<2x1x32xf32, #tpu.memory_space<vmem>>, %arg8: memref<2x1x32xf32, #tpu.memory_space<vmem>>, %arg9: memref<2x32x64xf32, #tpu.memory_space<vmem>>, %arg10: memref<2x1x64xf32, #tpu.memory_space<vmem>>, %arg11: memref<2x64x32xf32, #tpu.memory_space<vmem>>, %arg12: memref<2x1x32xf32, #tpu.memory_space<vmem>>, %arg13: memref<2x1x32xf32, #tpu.memory_space<vmem>>, %arg14: memref<1x32xf32, #tpu.memory_space<vmem>>, %arg15: memref<32x16xf32, #tpu.memory_space<vmem>>, %arg16: memref<1x16xf32, #tpu.memory_space<vmem>>, %arg17: memref<1x8x16xf32, #tpu.memory_space<vmem>>) attributes {dimension_semantics = [#tpu.dimension_semantics<parallel>], iteration_bounds = array<i64: 2>, scalar_prefetch = 0 : i64, scratch_operands = 0 : i64, tpu.core_type = #tpu.core_type<tc>, window_params = [{transform_indices = @transform_0, window_bounds = array<i64: 1, 8, 32>}, {pipeline_mode = #tpu.pipeline_mode<synchronous>, transform_indices = @transform_1, window_bounds = array<i64: 8, 32>}, {pipeline_mode = #tpu.pipeline_mode<synchronous>, transform_indices = @transform_2, window_bounds = array<i64: 8, 8>}, {pipeline_mode = #tpu.pipeline_mode<synchronous>, transform_indices = @transform_3, window_bounds = array<i64: 2, 4, 32, 24>}, {pipeline_mode = #tpu.pipeline_mode<synchronous>, transform_indices = @transform_4, window_bounds = array<i64: 2, 4, 1, 24>}, {pipeline_mode = #tpu.pipeline_mode<synchronous>, transform_indices = @transform_5, window_bounds = array<i64: 2, 4, 8, 32>}, {pipeline_mode = #tpu.pipeline_mode<synchronous>, transform_indices = @transform_6, window_bounds = array<i64: 2, 1, 32>}, {pipeline_mode = #tpu.pipeline_mode<synchronous>, transform_indices = @transform_7, window_bounds = array<i64: 2, 1, 32>}, {pipeline_mode = #tpu.pipeline_mode<synchronous>, transform_indices = @transform_8, window_bounds = array<i64: 2, 32, 64>}, {pipeline_mode = #tpu.pipeline_mode<synchronous>, transform_indices = @transform_9, window_bounds = array<i64: 2, 1, 64>}, {pipeline_mode = #tpu.pipeline_mode<synchronous>, transform_indices = @transform_10, window_bounds = array<i64: 2, 64, 32>}, {pipeline_mode = #tpu.pipeline_mode<synchronous>, transform_indices = @transform_11, window_bounds = array<i64: 2, 1, 32>}, {pipeline_mode = #tpu.pipeline_mode<synchronous>, transform_indices = @transform_12, window_bounds = array<i64: 2, 1, 32>}, {pipeline_mode = #tpu.pipeline_mode<synchronous>, transform_indices = @transform_13, window_bounds = array<i64: 1, 32>}, {pipeline_mode = #tpu.pipeline_mode<synchronous>, transform_indices = @transform_14, window_bounds = array<i64: 32, 16>}, {pipeline_mode = #tpu.pipeline_mode<synchronous>, transform_indices = @transform_15, window_bounds = array<i64: 1, 16>}, {transform_indices = @transform_16, window_bounds = array<i64: 1, 8, 16>}]} {
    %c0 = arith.constant 0 : index
    %c0_0 = arith.constant 0 : index
    %c0_1 = arith.constant 0 : index
    %0 = vector.load %arg1[%c0, %c0_0, %c0_1] : memref<1x8x32xf32, #tpu.memory_space<vmem>>, vector<1x8x32xf32>
    %1 = vector.shape_cast %0 : vector<1x8x32xf32> to vector<8x32xf32>
    %c0_2 = arith.constant 0 : index
    %c0_3 = arith.constant 0 : index
    %2 = vector.load %arg2[%c0_2, %c0_3] : memref<8x32xf32, #tpu.memory_space<vmem>>, vector<8x32xf32>
    %3 = arith.addf %1, %2 : vector<8x32xf32>
    %c0_4 = arith.constant 0 : index
    %c0_5 = arith.constant 0 : index
    %4 = vector.load %arg3[%c0_4, %c0_5] : memref<8x8xf32, #tpu.memory_space<vmem>>, vector<8x8xf32>
    %cst = arith.constant 0.000000e+00 : f32
    %5 = vector.broadcast %cst : f32 to vector<8x8xf32>
    %6 = arith.cmpf one, %4, %5 : vector<8x8xf32>
    %7 = vector.shape_cast %3 : vector<8x32xf32> to vector<1x8x32xf32>
    %8 = vector.shape_cast %7 : vector<1x8x32xf32> to vector<1x8x32xf32>
    %9 = vector.broadcast %8 : vector<1x8x32xf32> to vector<4x8x32xf32>
    %c0_6 = arith.constant 0 : index
    %c0_7 = arith.constant 0 : index
    %c0_8 = arith.constant 0 : index
    %c0_9 = arith.constant 0 : index
    %10 = vector.load %arg4[%c0_6, %c0_7, %c0_8, %c0_9] : memref<2x4x32x24xf32, #tpu.memory_space<vmem>>, vector<1x4x32x24xf32>
    %11 = vector.shape_cast %10 : vector<1x4x32x24xf32> to vector<4x32x24xf32>
    "tpu.trace_start"() <{level = 10 : i32, message = "hsd,hde->hse"}> : () -> ()
    %cst_10 = arith.constant dense<0.000000e+00> : vector<4x8x24xf32>
    %12 = tpu.matmul %9, %11, %cst_10 {dimension_numbers = #tpu.dot_dimension_numbers<[2], [1], [1], [2], [0, 0, 0, 1, 1, 2], [0], [0]>} : vector<4x8x32xf32>, vector<4x32x24xf32>, vector<4x8x24xf32> -> vector<4x8x24xf32>
    "tpu.trace_stop"() : () -> ()
    %c0_11 = arith.constant 0 : index
    %c0_12 = arith.constant 0 : index
    %c0_13 = arith.constant 0 : index
    %c0_14 = arith.constant 0 : index
    %13 = vector.load %arg5[%c0_11, %c0_12, %c0_13, %c0_14] : memref<2x4x1x24xf32, #tpu.memory_space<vmem>>, vector<1x4x1x24xf32>
    %14 = vector.shape_cast %13 : vector<1x4x1x24xf32> to vector<4x1x24xf32>
    %15 = vector.broadcast %14 : vector<4x1x24xf32> to vector<4x8x24xf32>
    %16 = arith.addf %12, %15 : vector<4x8x24xf32>
    %17 = vector.extract_strided_slice %16 {offsets = [0, 0, 0], sizes = [4, 8, 8], strides = [1, 1, 1]} : vector<4x8x24xf32> to vector<4x8x8xf32>
    %18 = vector.extract_strided_slice %16 {offsets = [0, 0, 8], sizes = [4, 8, 8], strides = [1, 1, 1]} : vector<4x8x24xf32> to vector<4x8x8xf32>
    %19 = vector.extract_strided_slice %16 {offsets = [0, 0, 16], sizes = [4, 8, 8], strides = [1, 1, 1]} : vector<4x8x24xf32> to vector<4x8x8xf32>
    "tpu.trace_start"() <{level = 10 : i32, message = "hqe,hke->hqk"}> : () -> ()
    %cst_15 = arith.constant dense<0.000000e+00> : vector<4x8x8xf32>
    %20 = tpu.matmul %17, %18, %cst_15 {dimension_numbers = #tpu.dot_dimension_numbers<[2], [2], [1], [1], [0, 0, 0, 1, 1, 1], [0], [0]>} : vector<4x8x8xf32>, vector<4x8x8xf32>, vector<4x8x8xf32> -> vector<4x8x8xf32>
    "tpu.trace_stop"() : () -> ()
    %cst_16 = arith.constant 0.353553385 : f32
    %21 = vector.broadcast %cst_16 : f32 to vector<4x8x8xf32>
    %22 = arith.mulf %20, %21 : vector<4x8x8xf32>
    %23 = vector.shape_cast %6 : vector<8x8xi1> to vector<1x8x8xi1>
    %cst_17 = arith.constant -1.000000e+09 : f32
    %24 = vector.shape_cast %23 : vector<1x8x8xi1> to vector<1x8x8xi1>
    %25 = vector.broadcast %24 : vector<1x8x8xi1> to vector<4x8x8xi1>
    %26 = vector.broadcast %cst_17 : f32 to vector<4x8x8xf32>
    %27 = arith.select %25, %22, %26 : vector<4x8x8xi1>, vector<4x8x8xf32>
    %cst_18 = arith.constant dense<0xFF800000> : vector<4x8xf32>
    %28 = vector.multi_reduction <maximumf>, %27, %cst_18 [2] : vector<4x8x8xf32> to vector<4x8xf32>
    %29 = vector.shape_cast %28 : vector<4x8xf32> to vector<4x8x1xf32>
    %30 = vector.broadcast %29 : vector<4x8x1xf32> to vector<4x8x8xf32>
    %31 = arith.subf %27, %30 : vector<4x8x8xf32>
    %32 = math.exp %31 : vector<4x8x8xf32>
    %cst_19 = arith.constant dense<0.000000e+00> : vector<4x8xf32>
    %33 = vector.multi_reduction <add>, %32, %cst_19 [2] : vector<4x8x8xf32> to vector<4x8xf32>
    %34 = vector.shape_cast %33 : vector<4x8xf32> to vector<4x8x1xf32>
    %35 = tpu.reciprocal %34 {approx = true} : vector<4x8x1xf32> -> vector<4x8x1xf32>
    %36 = vector.broadcast %35 : vector<4x8x1xf32> to vector<4x8x8xf32>
    %37 = arith.mulf %32, %36 : vector<4x8x8xf32>
    "tpu.trace_start"() <{level = 10 : i32, message = "hqk,hke->hqe"}> : () -> ()
    %cst_20 = arith.constant dense<0.000000e+00> : vector<4x8x8xf32>
    %38 = tpu.matmul %37, %19, %cst_20 {dimension_numbers = #tpu.dot_dimension_numbers<[2], [1], [1], [2], [0, 0, 0, 1, 1, 2], [0], [0]>} : vector<4x8x8xf32>, vector<4x8x8xf32>, vector<4x8x8xf32> -> vector<4x8x8xf32>
    "tpu.trace_stop"() : () -> ()
    %c0_21 = arith.constant 0 : index
    %c0_22 = arith.constant 0 : index
    %c0_23 = arith.constant 0 : index
    %c0_24 = arith.constant 0 : index
    %39 = vector.load %arg6[%c0_21, %c0_22, %c0_23, %c0_24] : memref<2x4x8x32xf32, #tpu.memory_space<vmem>>, vector<1x4x8x32xf32>
    %40 = vector.shape_cast %39 : vector<1x4x8x32xf32> to vector<4x8x32xf32>
    "tpu.trace_start"() <{level = 10 : i32, message = "hqe,hed->hqd"}> : () -> ()
    %cst_25 = arith.constant dense<0.000000e+00> : vector<4x8x32xf32>
    %41 = tpu.matmul %38, %40, %cst_25 {dimension_numbers = #tpu.dot_dimension_numbers<[2], [1], [1], [2], [0, 0, 0, 1, 1, 2], [0], [0]>} : vector<4x8x8xf32>, vector<4x8x32xf32>, vector<4x8x32xf32> -> vector<4x8x32xf32>
    "tpu.trace_stop"() : () -> ()
    %cst_26 = arith.constant dense<0.000000e+00> : vector<8x32xf32>
    %42 = vector.multi_reduction <add>, %41, %cst_26 [0] : vector<4x8x32xf32> to vector<8x32xf32>
    %c0_27 = arith.constant 0 : index
    %c0_28 = arith.constant 0 : index
    %c0_29 = arith.constant 0 : index
    %43 = vector.load %arg7[%c0_27, %c0_28, %c0_29] : memref<2x1x32xf32, #tpu.memory_space<vmem>>, vector<1x1x32xf32>
    %44 = vector.shape_cast %43 : vector<1x1x32xf32> to vector<1x32xf32>
    %45 = vector.broadcast %44 : vector<1x32xf32> to vector<8x32xf32>
    %46 = arith.addf %42, %45 : vector<8x32xf32>
    %47 = arith.mulf %46, %46 : vector<8x32xf32>
    %cst_30 = arith.constant dense<0.000000e+00> : vector<8xf32>
    %48 = vector.multi_reduction <add>, %47, %cst_30 [1] : vector<8x32xf32> to vector<8xf32>
    %49 = vector.shape_cast %48 : vector<8xf32> to vector<8x1xf32>
    %cst_31 = arith.constant 3.200000e+01 : f32
    %50 = vector.broadcast %cst_31 : f32 to vector<8x1xf32>
    %51 = arith.divf %49, %50 : vector<8x1xf32>
    %cst_32 = arith.constant 9.99999997E-7 : f32
    %52 = vector.broadcast %cst_32 : f32 to vector<8x1xf32>
    %53 = arith.addf %51, %52 : vector<8x1xf32>
    %54 = math.rsqrt %53 : vector<8x1xf32>
    %55 = vector.broadcast %54 : vector<8x1xf32> to vector<8x32xf32>
    %56 = arith.mulf %46, %55 : vector<8x32xf32>
    %c0_33 = arith.constant 0 : index
    %c0_34 = arith.constant 0 : index
    %c0_35 = arith.constant 0 : index
    %57 = vector.load %arg8[%c0_33, %c0_34, %c0_35] : memref<2x1x32xf32, #tpu.memory_space<vmem>>, vector<1x1x32xf32>
    %58 = vector.shape_cast %57 : vector<1x1x32xf32> to vector<1x32xf32>
    %59 = vector.broadcast %58 : vector<1x32xf32> to vector<8x32xf32>
    %60 = arith.mulf %59, %56 : vector<8x32xf32>
    %61 = arith.addf %3, %60 : vector<8x32xf32>
    %c0_36 = arith.constant 0 : index
    %c0_37 = arith.constant 0 : index
    %c0_38 = arith.constant 0 : index
    %62 = vector.load %arg9[%c0_36, %c0_37, %c0_38] : memref<2x32x64xf32, #tpu.memory_space<vmem>>, vector<1x32x64xf32>
    %63 = vector.shape_cast %62 : vector<1x32x64xf32> to vector<32x64xf32>
    %cst_39 = arith.constant dense<0.000000e+00> : vector<8x64xf32>
    %64 = tpu.matmul %61, %63, %cst_39 {dimension_numbers = #tpu.dot_dimension_numbers<[1], [0], [0], [1], [0, 0, 1, 1], [], []>} : vector<8x32xf32>, vector<32x64xf32>, vector<8x64xf32> -> vector<8x64xf32>
    %c0_40 = arith.constant 0 : index
    %c0_41 = arith.constant 0 : index
    %c0_42 = arith.constant 0 : index
    %65 = vector.load %arg10[%c0_40, %c0_41, %c0_42] : memref<2x1x64xf32, #tpu.memory_space<vmem>>, vector<1x1x64xf32>
    %66 = vector.shape_cast %65 : vector<1x1x64xf32> to vector<1x64xf32>
    %67 = vector.broadcast %66 : vector<1x64xf32> to vector<8x64xf32>
    %68 = arith.addf %64, %67 : vector<8x64xf32>
    %69 = arith.negf %68 : vector<8x64xf32>
    %70 = math.exp %69 : vector<8x64xf32>
    %cst_43 = arith.constant 1.000000e+00 : f32
    %71 = vector.broadcast %cst_43 : f32 to vector<8x64xf32>
    %72 = arith.addf %71, %70 : vector<8x64xf32>
    %73 = arith.divf %71, %72 : vector<8x64xf32>
    %74 = arith.mulf %68, %73 : vector<8x64xf32>
    %c0_44 = arith.constant 0 : index
    %c0_45 = arith.constant 0 : index
    %c0_46 = arith.constant 0 : index
    %75 = vector.load %arg11[%c0_44, %c0_45, %c0_46] : memref<2x64x32xf32, #tpu.memory_space<vmem>>, vector<1x64x32xf32>
    %76 = vector.shape_cast %75 : vector<1x64x32xf32> to vector<64x32xf32>
    %cst_47 = arith.constant dense<0.000000e+00> : vector<8x32xf32>
    %77 = tpu.matmul %74, %76, %cst_47 {dimension_numbers = #tpu.dot_dimension_numbers<[1], [0], [0], [1], [0, 0, 1, 1], [], []>} : vector<8x64xf32>, vector<64x32xf32>, vector<8x32xf32> -> vector<8x32xf32>
    %c0_48 = arith.constant 0 : index
    %c0_49 = arith.constant 0 : index
    %c0_50 = arith.constant 0 : index
    %78 = vector.load %arg12[%c0_48, %c0_49, %c0_50] : memref<2x1x32xf32, #tpu.memory_space<vmem>>, vector<1x1x32xf32>
    %79 = vector.shape_cast %78 : vector<1x1x32xf32> to vector<1x32xf32>
    %80 = vector.broadcast %79 : vector<1x32xf32> to vector<8x32xf32>
    %81 = arith.addf %77, %80 : vector<8x32xf32>
    %82 = arith.mulf %81, %81 : vector<8x32xf32>
    %cst_51 = arith.constant dense<0.000000e+00> : vector<8xf32>
    %83 = vector.multi_reduction <add>, %82, %cst_51 [1] : vector<8x32xf32> to vector<8xf32>
    %84 = vector.shape_cast %83 : vector<8xf32> to vector<8x1xf32>
    %cst_52 = arith.constant 3.200000e+01 : f32
    %85 = vector.broadcast %cst_52 : f32 to vector<8x1xf32>
    %86 = arith.divf %84, %85 : vector<8x1xf32>
    %cst_53 = arith.constant 9.99999997E-7 : f32
    %87 = vector.broadcast %cst_53 : f32 to vector<8x1xf32>
    %88 = arith.addf %86, %87 : vector<8x1xf32>
    %89 = math.rsqrt %88 : vector<8x1xf32>
    %90 = vector.broadcast %89 : vector<8x1xf32> to vector<8x32xf32>
    %91 = arith.mulf %81, %90 : vector<8x32xf32>
    %c0_54 = arith.constant 0 : index
    %c0_55 = arith.constant 0 : index
    %c0_56 = arith.constant 0 : index
    %92 = vector.load %arg13[%c0_54, %c0_55, %c0_56] : memref<2x1x32xf32, #tpu.memory_space<vmem>>, vector<1x1x32xf32>
    %93 = vector.shape_cast %92 : vector<1x1x32xf32> to vector<1x32xf32>
    %94 = vector.broadcast %93 : vector<1x32xf32> to vector<8x32xf32>
    %95 = arith.mulf %94, %91 : vector<8x32xf32>
    %96 = arith.addf %61, %95 : vector<8x32xf32>
    %97 = vector.shape_cast %96 : vector<8x32xf32> to vector<1x8x32xf32>
    %98 = vector.shape_cast %97 : vector<1x8x32xf32> to vector<1x8x32xf32>
    %99 = vector.broadcast %98 : vector<1x8x32xf32> to vector<4x8x32xf32>
    %c1 = arith.constant 1 : index
    %c0_57 = arith.constant 0 : index
    %c0_58 = arith.constant 0 : index
    %c0_59 = arith.constant 0 : index
    %100 = vector.load %arg4[%c1, %c0_57, %c0_58, %c0_59] : memref<2x4x32x24xf32, #tpu.memory_space<vmem>>, vector<1x4x32x24xf32>
    %101 = vector.shape_cast %100 : vector<1x4x32x24xf32> to vector<4x32x24xf32>
    "tpu.trace_start"() <{level = 10 : i32, message = "hsd,hde->hse"}> : () -> ()
    %cst_60 = arith.constant dense<0.000000e+00> : vector<4x8x24xf32>
    %102 = tpu.matmul %99, %101, %cst_60 {dimension_numbers = #tpu.dot_dimension_numbers<[2], [1], [1], [2], [0, 0, 0, 1, 1, 2], [0], [0]>} : vector<4x8x32xf32>, vector<4x32x24xf32>, vector<4x8x24xf32> -> vector<4x8x24xf32>
    "tpu.trace_stop"() : () -> ()
    %c1_61 = arith.constant 1 : index
    %c0_62 = arith.constant 0 : index
    %c0_63 = arith.constant 0 : index
    %c0_64 = arith.constant 0 : index
    %103 = vector.load %arg5[%c1_61, %c0_62, %c0_63, %c0_64] : memref<2x4x1x24xf32, #tpu.memory_space<vmem>>, vector<1x4x1x24xf32>
    %104 = vector.shape_cast %103 : vector<1x4x1x24xf32> to vector<4x1x24xf32>
    %105 = vector.broadcast %104 : vector<4x1x24xf32> to vector<4x8x24xf32>
    %106 = arith.addf %102, %105 : vector<4x8x24xf32>
    %107 = vector.extract_strided_slice %106 {offsets = [0, 0, 0], sizes = [4, 8, 8], strides = [1, 1, 1]} : vector<4x8x24xf32> to vector<4x8x8xf32>
    %108 = vector.extract_strided_slice %106 {offsets = [0, 0, 8], sizes = [4, 8, 8], strides = [1, 1, 1]} : vector<4x8x24xf32> to vector<4x8x8xf32>
    %109 = vector.extract_strided_slice %106 {offsets = [0, 0, 16], sizes = [4, 8, 8], strides = [1, 1, 1]} : vector<4x8x24xf32> to vector<4x8x8xf32>
    "tpu.trace_start"() <{level = 10 : i32, message = "hqe,hke->hqk"}> : () -> ()
    %cst_65 = arith.constant dense<0.000000e+00> : vector<4x8x8xf32>
    %110 = tpu.matmul %107, %108, %cst_65 {dimension_numbers = #tpu.dot_dimension_numbers<[2], [2], [1], [1], [0, 0, 0, 1, 1, 1], [0], [0]>} : vector<4x8x8xf32>, vector<4x8x8xf32>, vector<4x8x8xf32> -> vector<4x8x8xf32>
    "tpu.trace_stop"() : () -> ()
    %cst_66 = arith.constant 0.353553385 : f32
    %111 = vector.broadcast %cst_66 : f32 to vector<4x8x8xf32>
    %112 = arith.mulf %110, %111 : vector<4x8x8xf32>
    %113 = vector.shape_cast %6 : vector<8x8xi1> to vector<1x8x8xi1>
    %cst_67 = arith.constant -1.000000e+09 : f32
    %114 = vector.shape_cast %113 : vector<1x8x8xi1> to vector<1x8x8xi1>
    %115 = vector.broadcast %114 : vector<1x8x8xi1> to vector<4x8x8xi1>
    %116 = vector.broadcast %cst_67 : f32 to vector<4x8x8xf32>
    %117 = arith.select %115, %112, %116 : vector<4x8x8xi1>, vector<4x8x8xf32>
    %cst_68 = arith.constant dense<0xFF800000> : vector<4x8xf32>
    %118 = vector.multi_reduction <maximumf>, %117, %cst_68 [2] : vector<4x8x8xf32> to vector<4x8xf32>
    %119 = vector.shape_cast %118 : vector<4x8xf32> to vector<4x8x1xf32>
    %120 = vector.broadcast %119 : vector<4x8x1xf32> to vector<4x8x8xf32>
    %121 = arith.subf %117, %120 : vector<4x8x8xf32>
    %122 = math.exp %121 : vector<4x8x8xf32>
    %cst_69 = arith.constant dense<0.000000e+00> : vector<4x8xf32>
    %123 = vector.multi_reduction <add>, %122, %cst_69 [2] : vector<4x8x8xf32> to vector<4x8xf32>
    %124 = vector.shape_cast %123 : vector<4x8xf32> to vector<4x8x1xf32>
    %125 = tpu.reciprocal %124 {approx = true} : vector<4x8x1xf32> -> vector<4x8x1xf32>
    %126 = vector.broadcast %125 : vector<4x8x1xf32> to vector<4x8x8xf32>
    %127 = arith.mulf %122, %126 : vector<4x8x8xf32>
    "tpu.trace_start"() <{level = 10 : i32, message = "hqk,hke->hqe"}> : () -> ()
    %cst_70 = arith.constant dense<0.000000e+00> : vector<4x8x8xf32>
    %128 = tpu.matmul %127, %109, %cst_70 {dimension_numbers = #tpu.dot_dimension_numbers<[2], [1], [1], [2], [0, 0, 0, 1, 1, 2], [0], [0]>} : vector<4x8x8xf32>, vector<4x8x8xf32>, vector<4x8x8xf32> -> vector<4x8x8xf32>
    "tpu.trace_stop"() : () -> ()
    %c1_71 = arith.constant 1 : index
    %c0_72 = arith.constant 0 : index
    %c0_73 = arith.constant 0 : index
    %c0_74 = arith.constant 0 : index
    %129 = vector.load %arg6[%c1_71, %c0_72, %c0_73, %c0_74] : memref<2x4x8x32xf32, #tpu.memory_space<vmem>>, vector<1x4x8x32xf32>
    %130 = vector.shape_cast %129 : vector<1x4x8x32xf32> to vector<4x8x32xf32>
    "tpu.trace_start"() <{level = 10 : i32, message = "hqe,hed->hqd"}> : () -> ()
    %cst_75 = arith.constant dense<0.000000e+00> : vector<4x8x32xf32>
    %131 = tpu.matmul %128, %130, %cst_75 {dimension_numbers = #tpu.dot_dimension_numbers<[2], [1], [1], [2], [0, 0, 0, 1, 1, 2], [0], [0]>} : vector<4x8x8xf32>, vector<4x8x32xf32>, vector<4x8x32xf32> -> vector<4x8x32xf32>
    "tpu.trace_stop"() : () -> ()
    %cst_76 = arith.constant dense<0.000000e+00> : vector<8x32xf32>
    %132 = vector.multi_reduction <add>, %131, %cst_76 [0] : vector<4x8x32xf32> to vector<8x32xf32>
    %c1_77 = arith.constant 1 : index
    %c0_78 = arith.constant 0 : index
    %c0_79 = arith.constant 0 : index
    %133 = vector.load %arg7[%c1_77, %c0_78, %c0_79] : memref<2x1x32xf32, #tpu.memory_space<vmem>>, vector<1x1x32xf32>
    %134 = vector.shape_cast %133 : vector<1x1x32xf32> to vector<1x32xf32>
    %135 = vector.broadcast %134 : vector<1x32xf32> to vector<8x32xf32>
    %136 = arith.addf %132, %135 : vector<8x32xf32>
    %137 = arith.mulf %136, %136 : vector<8x32xf32>
    %cst_80 = arith.constant dense<0.000000e+00> : vector<8xf32>
    %138 = vector.multi_reduction <add>, %137, %cst_80 [1] : vector<8x32xf32> to vector<8xf32>
    %139 = vector.shape_cast %138 : vector<8xf32> to vector<8x1xf32>
    %cst_81 = arith.constant 3.200000e+01 : f32
    %140 = vector.broadcast %cst_81 : f32 to vector<8x1xf32>
    %141 = arith.divf %139, %140 : vector<8x1xf32>
    %cst_82 = arith.constant 9.99999997E-7 : f32
    %142 = vector.broadcast %cst_82 : f32 to vector<8x1xf32>
    %143 = arith.addf %141, %142 : vector<8x1xf32>
    %144 = math.rsqrt %143 : vector<8x1xf32>
    %145 = vector.broadcast %144 : vector<8x1xf32> to vector<8x32xf32>
    %146 = arith.mulf %136, %145 : vector<8x32xf32>
    %c1_83 = arith.constant 1 : index
    %c0_84 = arith.constant 0 : index
    %c0_85 = arith.constant 0 : index
    %147 = vector.load %arg8[%c1_83, %c0_84, %c0_85] : memref<2x1x32xf32, #tpu.memory_space<vmem>>, vector<1x1x32xf32>
    %148 = vector.shape_cast %147 : vector<1x1x32xf32> to vector<1x32xf32>
    %149 = vector.broadcast %148 : vector<1x32xf32> to vector<8x32xf32>
    %150 = arith.mulf %149, %146 : vector<8x32xf32>
    %151 = arith.addf %96, %150 : vector<8x32xf32>
    %c1_86 = arith.constant 1 : index
    %c0_87 = arith.constant 0 : index
    %c0_88 = arith.constant 0 : index
    %152 = vector.load %arg9[%c1_86, %c0_87, %c0_88] : memref<2x32x64xf32, #tpu.memory_space<vmem>>, vector<1x32x64xf32>
    %153 = vector.shape_cast %152 : vector<1x32x64xf32> to vector<32x64xf32>
    %cst_89 = arith.constant dense<0.000000e+00> : vector<8x64xf32>
    %154 = tpu.matmul %151, %153, %cst_89 {dimension_numbers = #tpu.dot_dimension_numbers<[1], [0], [0], [1], [0, 0, 1, 1], [], []>} : vector<8x32xf32>, vector<32x64xf32>, vector<8x64xf32> -> vector<8x64xf32>
    %c1_90 = arith.constant 1 : index
    %c0_91 = arith.constant 0 : index
    %c0_92 = arith.constant 0 : index
    %155 = vector.load %arg10[%c1_90, %c0_91, %c0_92] : memref<2x1x64xf32, #tpu.memory_space<vmem>>, vector<1x1x64xf32>
    %156 = vector.shape_cast %155 : vector<1x1x64xf32> to vector<1x64xf32>
    %157 = vector.broadcast %156 : vector<1x64xf32> to vector<8x64xf32>
    %158 = arith.addf %154, %157 : vector<8x64xf32>
    %159 = arith.negf %158 : vector<8x64xf32>
    %160 = math.exp %159 : vector<8x64xf32>
    %cst_93 = arith.constant 1.000000e+00 : f32
    %161 = vector.broadcast %cst_93 : f32 to vector<8x64xf32>
    %162 = arith.addf %161, %160 : vector<8x64xf32>
    %163 = arith.divf %161, %162 : vector<8x64xf32>
    %164 = arith.mulf %158, %163 : vector<8x64xf32>
    %c1_94 = arith.constant 1 : index
    %c0_95 = arith.constant 0 : index
    %c0_96 = arith.constant 0 : index
    %165 = vector.load %arg11[%c1_94, %c0_95, %c0_96] : memref<2x64x32xf32, #tpu.memory_space<vmem>>, vector<1x64x32xf32>
    %166 = vector.shape_cast %165 : vector<1x64x32xf32> to vector<64x32xf32>
    %cst_97 = arith.constant dense<0.000000e+00> : vector<8x32xf32>
    %167 = tpu.matmul %164, %166, %cst_97 {dimension_numbers = #tpu.dot_dimension_numbers<[1], [0], [0], [1], [0, 0, 1, 1], [], []>} : vector<8x64xf32>, vector<64x32xf32>, vector<8x32xf32> -> vector<8x32xf32>
    %c1_98 = arith.constant 1 : index
    %c0_99 = arith.constant 0 : index
    %c0_100 = arith.constant 0 : index
    %168 = vector.load %arg12[%c1_98, %c0_99, %c0_100] : memref<2x1x32xf32, #tpu.memory_space<vmem>>, vector<1x1x32xf32>
    %169 = vector.shape_cast %168 : vector<1x1x32xf32> to vector<1x32xf32>
    %170 = vector.broadcast %169 : vector<1x32xf32> to vector<8x32xf32>
    %171 = arith.addf %167, %170 : vector<8x32xf32>
    %172 = arith.mulf %171, %171 : vector<8x32xf32>
    %cst_101 = arith.constant dense<0.000000e+00> : vector<8xf32>
    %173 = vector.multi_reduction <add>, %172, %cst_101 [1] : vector<8x32xf32> to vector<8xf32>
    %174 = vector.shape_cast %173 : vector<8xf32> to vector<8x1xf32>
    %cst_102 = arith.constant 3.200000e+01 : f32
    %175 = vector.broadcast %cst_102 : f32 to vector<8x1xf32>
    %176 = arith.divf %174, %175 : vector<8x1xf32>
    %cst_103 = arith.constant 9.99999997E-7 : f32
    %177 = vector.broadcast %cst_103 : f32 to vector<8x1xf32>
    %178 = arith.addf %176, %177 : vector<8x1xf32>
    %179 = math.rsqrt %178 : vector<8x1xf32>
    %180 = vector.broadcast %179 : vector<8x1xf32> to vector<8x32xf32>
    %181 = arith.mulf %171, %180 : vector<8x32xf32>
    %c1_104 = arith.constant 1 : index
    %c0_105 = arith.constant 0 : index
    %c0_106 = arith.constant 0 : index
    %182 = vector.load %arg13[%c1_104, %c0_105, %c0_106] : memref<2x1x32xf32, #tpu.memory_space<vmem>>, vector<1x1x32xf32>
    %183 = vector.shape_cast %182 : vector<1x1x32xf32> to vector<1x32xf32>
    %184 = vector.broadcast %183 : vector<1x32xf32> to vector<8x32xf32>
    %185 = arith.mulf %184, %181 : vector<8x32xf32>
    %186 = arith.addf %151, %185 : vector<8x32xf32>
    %187 = arith.mulf %186, %186 : vector<8x32xf32>
    %cst_107 = arith.constant dense<0.000000e+00> : vector<8xf32>
    %188 = vector.multi_reduction <add>, %187, %cst_107 [1] : vector<8x32xf32> to vector<8xf32>
    %189 = vector.shape_cast %188 : vector<8xf32> to vector<8x1xf32>
    %cst_108 = arith.constant 3.200000e+01 : f32
    %190 = vector.broadcast %cst_108 : f32 to vector<8x1xf32>
    %191 = arith.divf %189, %190 : vector<8x1xf32>
    %cst_109 = arith.constant 9.99999997E-7 : f32
    %192 = vector.broadcast %cst_109 : f32 to vector<8x1xf32>
    %193 = arith.addf %191, %192 : vector<8x1xf32>
    %194 = math.rsqrt %193 : vector<8x1xf32>
    %195 = vector.broadcast %194 : vector<8x1xf32> to vector<8x32xf32>
    %196 = arith.mulf %186, %195 : vector<8x32xf32>
    %c0_110 = arith.constant 0 : index
    %c0_111 = arith.constant 0 : index
    %197 = vector.load %arg14[%c0_110, %c0_111] : memref<1x32xf32, #tpu.memory_space<vmem>>, vector<1x32xf32>
    %198 = vector.broadcast %197 : vector<1x32xf32> to vector<8x32xf32>
    %199 = arith.mulf %198, %196 : vector<8x32xf32>
    %c0_112 = arith.constant 0 : index
    %c0_113 = arith.constant 0 : index
    %200 = vector.load %arg15[%c0_112, %c0_113] : memref<32x16xf32, #tpu.memory_space<vmem>>, vector<32x16xf32>
    %cst_114 = arith.constant dense<0.000000e+00> : vector<8x16xf32>
    %201 = tpu.matmul %199, %200, %cst_114 {dimension_numbers = #tpu.dot_dimension_numbers<[1], [0], [0], [1], [0, 0, 1, 1], [], []>} : vector<8x32xf32>, vector<32x16xf32>, vector<8x16xf32> -> vector<8x16xf32>
    %c0_115 = arith.constant 0 : index
    %c0_116 = arith.constant 0 : index
    %202 = vector.load %arg16[%c0_115, %c0_116] : memref<1x16xf32, #tpu.memory_space<vmem>>, vector<1x16xf32>
    %203 = vector.broadcast %202 : vector<1x16xf32> to vector<8x16xf32>
    %204 = arith.addf %201, %203 : vector<8x16xf32>
    %c0_117 = arith.constant 0 : index
    %c0_118 = arith.constant 0 : index
    %c0_119 = arith.constant 0 : index
    %205 = vector.load %arg17[%c0_117, %c0_118, %c0_119] : memref<1x8x16xf32, #tpu.memory_space<vmem>>, vector<1x8x16xf32>
    %206 = vector.shape_cast %205 : vector<1x8x16xf32> to vector<8x16xf32>
    %207 = vector.shape_cast %204 : vector<8x16xf32> to vector<1x8x16xf32>
    tpu.vector_store %arg17[%c0_117, %c0_118, %c0_119], %207 {strides = array<i32>} : memref<1x8x16xf32, #tpu.memory_space<vmem>>, vector<1x8x16xf32>,
    return
  }
  func.func @transform_0(%arg0: i32) -> (i32, i32, i32) {
    %c0_i32 = arith.constant 0 : i32
    %c0_i32_0 = arith.constant 0 : i32
    %c0_i32_1 = arith.constant 0 : i32
    return %arg0, %c0_i32, %c0_i32_0 : i32, i32, i32
  }
  func.func @transform_1(%arg0: i32) -> (i32, i32) {
    %c0_i32 = arith.constant 0 : i32
    %c0_i32_0 = arith.constant 0 : i32
    %c0_i32_1 = arith.constant 0 : i32
    return %c0_i32, %c0_i32_0 : i32, i32
  }
  func.func @transform_2(%arg0: i32) -> (i32, i32) {
    %c0_i32 = arith.constant 0 : i32
    %c0_i32_0 = arith.constant 0 : i32
    %c0_i32_1 = arith.constant 0 : i32
    return %c0_i32, %c0_i32_0 : i32, i32
  }
  func.func @transform_3(%arg0: i32) -> (i32, i32, i32, i32) {
    %c0_i32 = arith.constant 0 : i32
    %c0_i32_0 = arith.constant 0 : i32
    %c0_i32_1 = arith.constant 0 : i32
    %c0_i32_2 = arith.constant 0 : i32
    %c0_i32_3 = arith.constant 0 : i32
    return %c0_i32, %c0_i32_0, %c0_i32_1, %c0_i32_2 : i32, i32, i32, i32
  }
  func.func @transform_4(%arg0: i32) -> (i32, i32, i32, i32) {
    %c0_i32 = arith.constant 0 : i32
    %c0_i32_0 = arith.constant 0 : i32
    %c0_i32_1 = arith.constant 0 : i32
    %c0_i32_2 = arith.constant 0 : i32
    %c0_i32_3 = arith.constant 0 : i32
    return %c0_i32, %c0_i32_0, %c0_i32_1, %c0_i32_2 : i32, i32, i32, i32
  }
  func.func @transform_5(%arg0: i32) -> (i32, i32, i32, i32) {
    %c0_i32 = arith.constant 0 : i32
    %c0_i32_0 = arith.constant 0 : i32
    %c0_i32_1 = arith.constant 0 : i32
    %c0_i32_2 = arith.constant 0 : i32
    %c0_i32_3 = arith.constant 0 : i32
    return %c0_i32, %c0_i32_0, %c0_i32_1, %c0_i32_2 : i32, i32, i32, i32
  }
  func.func @transform_6(%arg0: i32) -> (i32, i32, i32) {
    %c0_i32 = arith.constant 0 : i32
    %c0_i32_0 = arith.constant 0 : i32
    %c0_i32_1 = arith.constant 0 : i32
    %c0_i32_2 = arith.constant 0 : i32
    return %c0_i32, %c0_i32_0, %c0_i32_1 : i32, i32, i32
  }
  func.func @transform_7(%arg0: i32) -> (i32, i32, i32) {
    %c0_i32 = arith.constant 0 : i32
    %c0_i32_0 = arith.constant 0 : i32
    %c0_i32_1 = arith.constant 0 : i32
    %c0_i32_2 = arith.constant 0 : i32
    return %c0_i32, %c0_i32_0, %c0_i32_1 : i32, i32, i32
  }
  func.func @transform_8(%arg0: i32) -> (i32, i32, i32) {
    %c0_i32 = arith.constant 0 : i32
    %c0_i32_0 = arith.constant 0 : i32
    %c0_i32_1 = arith.constant 0 : i32
    %c0_i32_2 = arith.constant 0 : i32
    return %c0_i32, %c0_i32_0, %c0_i32_1 : i32, i32, i32
  }
  func.func @transform_9(%arg0: i32) -> (i32, i32, i32) {
    %c0_i32 = arith.constant 0 : i32
    %c0_i32_0 = arith.constant 0 : i32
    %c0_i32_1 = arith.constant 0 : i32
    %c0_i32_2 = arith.constant 0 : i32
    return %c0_i32, %c0_i32_0, %c0_i32_1 : i32, i32, i32
  }
  func.func @transform_10(%arg0: i32) -> (i32, i32, i32) {
    %c0_i32 = arith.constant 0 : i32
    %c0_i32_0 = arith.constant 0 : i32
    %c0_i32_1 = arith.constant 0 : i32
    %c0_i32_2 = arith.constant 0 : i32
    return %c0_i32, %c0_i32_0, %c0_i32_1 : i32, i32, i32
  }
  func.func @transform_11(%arg0: i32) -> (i32, i32, i32) {
    %c0_i32 = arith.constant 0 : i32
    %c0_i32_0 = arith.constant 0 : i32
    %c0_i32_1 = arith.constant 0 : i32
    %c0_i32_2 = arith.constant 0 : i32
    return %c0_i32, %c0_i32_0, %c0_i32_1 : i32, i32, i32
  }
  func.func @transform_12(%arg0: i32) -> (i32, i32, i32) {
    %c0_i32 = arith.constant 0 : i32
    %c0_i32_0 = arith.constant 0 : i32
    %c0_i32_1 = arith.constant 0 : i32
    %c0_i32_2 = arith.constant 0 : i32
    return %c0_i32, %c0_i32_0, %c0_i32_1 : i32, i32, i32
  }
  func.func @transform_13(%arg0: i32) -> (i32, i32) {
    %c0_i32 = arith.constant 0 : i32
    %c0_i32_0 = arith.constant 0 : i32
    %c0_i32_1 = arith.constant 0 : i32
    return %c0_i32, %c0_i32_0 : i32, i32
  }
  func.func @transform_14(%arg0: i32) -> (i32, i32) {
    %c0_i32 = arith.constant 0 : i32
    %c0_i32_0 = arith.constant 0 : i32
    %c0_i32_1 = arith.constant 0 : i32
    return %c0_i32, %c0_i32_0 : i32, i32
  }
  func.func @transform_15(%arg0: i32) -> (i32, i32) {
    %c0_i32 = arith.constant 0 : i32
    %c0_i32_0 = arith.constant 0 : i32
    %c0_i32_1 = arith.constant 0 : i32
    return %c0_i32, %c0_i32_0 : i32, i32
  }
  func.func @transform_16(%arg0: i32) -> (i32, i32, i32) {
    %c0_i32 = arith.constant 0 : i32
    %c0_i32_0 = arith.constant 0 : i32
    %c0_i32_1 = arith.constant 0 : i32
    return %arg0, %c0_i32, %c0_i32_0 : i32, i32, i32
  }
}

</mosaic_0001>

<bundles_post_ra>
// kernel: transformer_forward.1
= control target key start
LH: loop header
LB: loop body
LE: loop exit
PB: predicated region body
PF: predicated region fallthrough
CT: control target
= control target key end

     0   :  { %s5189_s0 = inlined_call_operand.vmem [shape: f32[2,8,32], index: 0, kind: input, shape index: {}]   ;;  %s5190_s1 = inlined_call_operand.vmem [shape: f32[8,32], index: 1, kind: input, shape index: {}]   ;;  %s5191_s2 = inlined_call_operand.vmem [shape: f32[8,8], index: 2, kind: input, shape index: {}]   ;;  %s5192_s3 = inlined_call_operand.vmem [shape: f32[2,4,32,24], index: 3, kind: input, shape index: {}]   ;;  %s5193_s4 = inlined_call_operand.vmem [shape: f32[2,4,1,24], index: 4, kind: input, shape index: {}]   ;;  %s5194_s5 = inlined_call_operand.vmem [shape: f32[2,4,8,32], index: 5, kind: input, shape index: {}]   ;;  %s5195_s6 = inlined_call_operand.vmem [shape: f32[2,1,32], index: 6, kind: input, shape index: {}]   ;;  %s5196_s7 = inlined_call_operand.vmem [shape: f32[2,1,32], index: 7, kind: input, shape index: {}]   ;;  %s5197_s8 = inlined_call_operand.vmem [shape: f32[2,32,64], index: 8, kind: input, shape index: {}]   ;;  %s5198_s9 = inlined_call_operand.vmem [shape: f32[2,1,64], index: 9, kind: input, shape index: {}]   ;;  %s5199_s10 = inlined_call_operand.vmem [shape: f32[2,64,32], index: 10, kind: input, shape index: {}]   ;;  %s5200_s11 = inlined_call_operand.vmem [shape: f32[2,1,32], index: 11, kind: input, shape index: {}]   ;;  %s5201_s12 = inlined_call_operand.vmem [shape: f32[2,1,32], index: 12, kind: input, shape index: {}]   ;;  %s5202_s13 = inlined_call_operand.vmem [shape: f32[1,32], index: 13, kind: input, shape index: {}]   ;;  %s5203_s14 = inlined_call_operand.vmem [shape: f32[32,16], index: 14, kind: input, shape index: {}]   ;;  %s5204_s15 = inlined_call_operand.vmem [shape: f32[1,16], index: 15, kind: input, shape index: {}]   ;;  %s5205_s16 = inlined_call_operand.hbm [shape: f32[2,8,16], index: 16, kind: output, shape index: {}]  }
   0x1   :  { %5212 = sst [smem:[#allocation11_spill]] %s5189_s0 }
   0x2   :  { %21 = vsyncpa [#allocation3], 0 }
   0x3   :  { %23 = vsyncpa [#allocation3 + $0x1], 0  ;;  %s4506_s21 = smov 0   ;;  %s4508_s22 = smov 0  }
   0x4   :  { %s4510_s23 = smov 0   ;;  %s4512_s24 = smov 0  }
   0x5 LB: > { %5213 = sst [smem:[#allocation5_spill]] %s4402_s21  ;;  %s4527_s25 = sadd.s32 4294967295, %s4414_s24   ;;  %s4414_s24 = sphi %s4512_s24, %s5225_s24   ;;  %s4410_s23 = sphi %s4510_s23, %s5227_s23   ;;  %s4406_s22 = sphi %s4508_s22, %s5229_s22   ;;  %s4402_s21 = sphi %s4506_s21, %s5228_s21  }
   0x6   : > { %5214 = sst [smem:[#allocation6_spill]] %s4410_s23  ;;  %s3743_s26 = sadd.s32 4294967294, %s4414_s24  }
   0x7   : > { %5215 = sst [smem:[#allocation7_spill]] %s4414_s24  ;;  %s4531_s27 = sadd.s32 1, %s4414_s24  }
   0x8   : > { %5216 = sst [smem:[#allocation8_spill]] %s4531_s27  ;;  %s377_s28 = sadd.s32 1, %s4410_s23 }
   0x9   : > { %s374_s29 = ssub.s32 %s4414_s24, %s4531_s27  ;;  %p387_p0 = scmp.ne.s32.totalorder %s4410_s23, %s4406_s22 }
   0xa   : > { %p375_p1 = scmp.eq.s32.totalorder %s374_s29, 0  ;;  %p388_p2 = scmp.eq.s32.totalorder %s4527_s25, 1 }
   0xb   : > { %p393_p3 = scmp.ne.s32.totalorder %s4406_s22, %s4402_s21  ;;  %p394_p4 = scmp.eq.s32.totalorder %s3743_s26, 1 }
   0xc   : > { %s4542_s30 = scalar_select %p375_p1, %s4410_s23, %s377_s28  }
   0xd   : > { %p4544_p5 = por %p388_p2, %p387_p0  ;;  %p4548_p6 = por %p394_p4, %p393_p3 }
   0xe   : > { %5217 = sst [smem:[#allocation9_spill]] %s4542_s30  ;;  %p3746_p7 = scmp.ge.s32.totalorder %s4414_s24, 1 }
   0xf   : > { %s5219_s17 = scalar_select %p4548_p6, 1, 0 }
  0x10   : > { %p464_p8 = scmp.lt.s32.totalorder %s4414_s24, 3 }
  0x11   : > { %5220 = sst [smem:[#allocation10_spill]] %s5219_s17 }
  0x12   : > { %p465_p9 = pnand %p3746_p7, %p464_p8 }
  0x13   : > { %p513_p10 = scmp.lt.s32.totalorder (!%p465_p9), %s4527_s25, 1  ;;  %s5221_s21 = sld [smem:[#allocation11_spill]] (!%p465_p9) }
  0x14   : > { %468 = sbr.rel (%p465_p9) target bundleno = 4366 (0x110e), region = 84  ;;  %s4418_s19 = smov (!%p465_p9), 120  }
  0x15   : > { %s510_s20 = sand.u32 (!%p465_p9), 1, %s4406_s22   ;;  %s3858_s17 = sshll.u32 (!%p465_p9), %s4527_s25, 7 }
  0x16   : > { %s3671_s23 = scalar_lea.sflag (!%p465_p9), [#allocation3], %s510_s20 }
  0x19   : > { %v525_v0 = vld [vmem:[%s5192_s3 + $0x18] sm:$0xff]  ;;  %v4416_v2 = vmov 0.0   ;;  %v524_v3 = vld [vmem:[%s5192_s3 + $0x10] sm:$0xff]  ;;  %s514_s18 = scalar_select %p513_p10, %s4527_s25, 1  ;;  %v523_v5 = vld [vmem:[%s5192_s3 + $0x8] sm:$0xff]  ;;  %vm4417_vm0 = vmmov 0  }
  0x1a   : > { %v529_v1 = vld [vmem:[%s5192_s3 + $0x38] sm:$0xff]  ;;  %3982 = vmatprep.subr.mxu0 %v4416_v2  ;;  %3993 = vmatprep.subr.mxu1 %v4416_v2  ;;  %v528_v4 = vld [vmem:[%s5192_s3 + $0x30] sm:$0xff]  ;;  %v527_v6 = vld [vmem:[%s5192_s3 + $0x28] sm:$0xff]  ;;  %vm566_vm1 = vcmask 261120   ;;  %vm853_vm2 = vcmask 64512   ;;  %vm1952_vm4 = vcmask 523264  }
  0x1b   : > { %3983 = vmatpush3.msra.mxu0 %v525_v0  ;;  %3994 = vmatpush3.msra.mxu1 %v529_v1  ;;  %s3748_s29 = sshll.u32 %s514_s18, 3  ;;  %v518_v7 = vld [vmem:[%s5190_s1] sm:$0xff]  ;;  %v533_v12 = vld [vmem:[%s5192_s3 + $0x58] sm:$0xff]  ;;  %v532_v13 = vld [vmem:[%s5192_s3 + $0x50] sm:$0xff]  ;;  %s3747_s18 = sshll.u32 %s510_s20, 3  ;;  %vm3668_vm5 = vcmask 130048  }
  0x1c   : > { %3984 = vmatprep.subr.mxu0 %v4416_v2  ;;  %3995 = vmatprep.subr.mxu1 %v4416_v2  ;;  %v522_v8 = vld [vmem:[%s5192_s3] sm:$0xff]  ;;  %s516_s24 = scalar_lea.vmem %s5221_s21, %s3748_s29  ;;  %v537_v14 = vld [vmem:[%s5192_s3 + $0x78] sm:$0xff]  ;;  %v531_v15 = vld [vmem:[%s5192_s3 + $0x48] sm:$0xff]  ;;  %s512_s21 = scalar_lea.vmem [#allocation2], %s3747_s18 }
  0x1d   : > { %3985 = vmatpush3.msra.mxu0 %v524_v3  ;;  %3996 = vmatpush3.msra.mxu1 %v528_v4  ;;  %v517_v9 = vld [vmem:[%s516_s24] sm:$0xff]  ;;  %v536_v16 = vld [vmem:[%s5192_s3 + $0x70] sm:$0xff]  ;;  %v535_v18 = vld [vmem:[%s5192_s3 + $0x68] sm:$0xff]  ;;  %s4419_s24 = smov 112   ;;  %s3684_s28 = sshll.u32 %s512_s21, 4  ;;  %s3685_s28 = int_to_ptr.vmem [resolvable:$true] %s3684_s28 }
  0x1e   : > { %3986 = vmatprep.subr.mxu0 %v4416_v2  ;;  %3997 = vmatprep.subr.mxu1 %v4416_v2  ;;  %v4592_v10 = vadd.f32 %v518_v7, %v517_v9  ;;  %v526_v11 = vld [vmem:[%s5192_s3 + $0x20] sm:$0xff]  ;;  %s4354_s30 = scalar_lea.vmem %s3685_s28, 128  ;;  %s4420_s25 = smov [#allocation2]  }
  0x1f   : > { %3987 = vmatpush3.msra.mxu0 %v523_v5  ;;  %3990 = vmatprep.mubr.msk.f32.mxu0 %vm4417_vm0, %v4416_v2  ;;  %v530_v17 = vld [vmem:[%s5192_s3 + $0x40] sm:$0xff]  ;;  %p4355_p11 = scmp.ne.s32.totalorder %s3685_s28, %s4354_s30  ;;  %s4358_s18 = sshll.u32 %s4420_s25, 4  ;;  %s4359_s18 = int_to_ptr.vmem [resolvable:$false] %s4358_s18 }
  0x20   : > { %3988 = vmatprep.subr.mxu0 %v4416_v2  ;;  %3998 = vmatpush3.msra.mxu1 %v527_v6  ;;  %v534_v19 = vld [vmem:[%s5192_s3 + $0x60] sm:$0xff]  ;;  %s4360_s26 = scalar_lea.vmem %s4359_s18, 256  ;;  %p4361_p0 = scmp.lt.s32.totalorder %s3685_s28, %s4359_s18 }
  0x21   : > { %3989 = vmatpush3.msra.mxu0 %v522_v8  ;;  %3999 = vmatprep.subr.mxu1 %v4416_v2  ;;  %v3749_v20 = vld [vmem:[%s5193_s4] ss:$0 sm:$0xff]  ;;  %v3750_v23 = vld [vmem:[%s5193_s4 + $0x1] ss:$0 sm:$0xff]  ;;  %v3751_v28 = vld [vmem:[%s5193_s4 + $0x2] ss:$0 sm:$0xff]  ;;  %p4356_p12 = pnand %p4355_p11, %p4544_p5  ;;  %p4362_p1 = scmp.lt.s32.totalorder %s4360_s26, %s4354_s30 }
  0x22   : > { %3991 = vmatmul.mubr.msk.f32.vlgmr.msra.gmra.mxu0 %vm566_vm1, %v4592_v10  ;;  %4004 = vmatprep.subr.mxu0 %v4416_v2  ;;  %v3752_v31 = vld [vmem:[%s5193_s4 + $0x3] ss:$0 sm:$0xff] }
  0x23   : > { %4000 = vmatpush3.msra.mxu1 %v526_v11  ;;  %4005 = vmatpush3.msra.mxu0 %v533_v12  ;;  %v4705_v40 = vld [vmem:[%s5191_s2] sm:$0xff]  ;;  %p4357_p13 = pneg %p4356_p12  ;;  %p4363_p2 = por %p4362_p1, %p4361_p0 }
  0x24   : > { %4001 = vmatprep.mubr.msk.f32.mxu1 %vm4417_vm0, %v4416_v2  ;;  %4006 = vmatprep.subr.mxu0 %v4416_v2  ;;  %vm521_vm3 = vcmp.ne.f32.partialorder %v4705_v40, 0.0 }
  0x25   : > { %4015 = vmatprep.subr.mxu1 %v4416_v2  ;;  %4002 = vmatmul.mubr.msk.f32.vlgmr.msra.gmra.mxu1 %vm566_vm1, %v4592_v10  ;;  %p4364_p3 = pnand %p4363_p2, %p4357_p13 }
  0x26   : > { %4007 = vmatpush3.msra.mxu0 %v532_v13  ;;  %4016 = vmatpush3.msra.mxu1 %v537_v14 }
  0x27   : > { %4008 = vmatprep.subr.mxu0 %v4416_v2  ;;  %4017 = vmatprep.subr.mxu1 %v4416_v2 }
  0x28   : > { %4009 = vmatpush3.msra.mxu0 %v531_v15  ;;  %4018 = vmatpush3.msra.mxu1 %v536_v16 }
  0x29   : > { %4010 = vmatprep.subr.mxu0 %v4416_v2  ;;  %4019 = vmatprep.subr.mxu1 %v4416_v2 }
  0x2a   : > { %4011 = vmatpush3.msra.mxu0 %v530_v17  ;;  %4012 = vmatprep.mubr.msk.f32.mxu0 %vm4417_vm0, %v4416_v2 }
  0x2b   : > { %4020 = vmatpush3.msra.mxu1 %v535_v18  ;;  %4013 = vmatmul.mubr.msk.f32.vlgmr.msra.gmra.mxu0 %vm566_vm1, %v4592_v10 }
  0x2c   : > { %4021 = vmatprep.subr.mxu1 %v4416_v2  ;;  %4023 = vmatprep.mubr.msk.f32.mxu1 %vm4417_vm0, %v4416_v2 }
  0x2d   : > { %4022 = vmatpush3.msra.mxu1 %v534_v19  ;;  %4026 = vmatprep.subr.mxu0 %v4416_v2 }
  0x2e   : > { %4024 = vmatmul.mubr.msk.f32.vlgmr.msra.gmra.mxu1 %vm566_vm1, %v4592_v10  ;;  %4028 = vmatprep.mubr.msk.f32.mxu0 %vm4417_vm0, %v4416_v2 }
  0x2f   : > { %4031 = vmatprep.subr.mxu1 %v4416_v2  ;;  %4033 = vmatprep.mubr.msk.f32.mxu1 %vm4417_vm0, %v4416_v2 }
  0xe2   : > { %v636_v21 = vpop.f32.mrf.mxu0 }
  0xe3   : > { %v4653_v22 = vadd.f32 %v3749_v20, %v636_v21 }
  0xe4   : > { %v3992_v24 = vpop.f32.mrf.mxu0 }
  0xe5   : > { %v706_v25 = vpop.f32.mrf.mxu1  ;;  %851 = vrot.lane.b32.xlu0 %v4653_v22, %s4418_s19 }
  0xe6   : > { %v4660_v26 = vadd.f32 %v3750_v23, %v706_v25 }
  0xe7   : > { %v4003_v27 = vpop.f32.mrf.mxu1 }
  0xe9   : > { %929 = vrot.lane.b32.xlu0 %v4660_v26, %s4418_s19 }
  0xeb   : > { %v776_v29 = vpop.f32.mrf.mxu0 }
  0xec   : > { %v4667_v30 = vadd.f32 %v3751_v28, %v776_v29 }
  0xed   : > { %v4014_v32 = vpop.f32.mrf.mxu0 }
  0xee   : > { %v846_v33 = vpop.f32.mrf.mxu1  ;;  %1006 = vrot.lane.b32.xlu1 %v4667_v30, %s4418_s19 }
  0xef   : > { %v4674_v34 = vadd.f32 %v3752_v31, %v846_v33 }
  0xf0   : > { %v4025_v35 = vpop.f32.mrf.mxu1 }
  0xf1   : > { %v1517_v35 = vld [vmem:[%s5194_s5] sm:$0xff] }
  0xf2   : > { %1083 = vrot.lane.b32.xlu1 %v4674_v34, %s4418_s19 }
 0x157   : > { %v852_v36 = vpop.permute.xlu0 %851 }
 0x158   : > { %4027 = vmatpush3.xpose.msk.msra.mxu0 %vm853_vm2, %v852_v36  ;;  %v1518_v36 = vld [vmem:[%s5194_s5 + $0x8] sm:$0xff] }
 0x159   : > { %4036 = vmatprep.subr.mxu0 %v4416_v2 }
 0x15b   : > { %4029 = vmatmul.mubr.msk.f32.vlgmr.msra.gmra.mxu0 %vm853_vm2, %v4653_v22  ;;  %v930_v37 = vpop.permute.xlu0 %929 }
 0x15c   : > { %4032 = vmatpush3.xpose.msk.msra.mxu1 %vm853_vm2, %v930_v37  ;;  %4038 = vmatprep.mubr.msk.f32.mxu0 %vm4417_vm0, %v4416_v2  ;;  %v1519_v37 = vld [vmem:[%s5194_s5 + $0x10] sm:$0xff] }
 0x15d   : > { %4041 = vmatprep.subr.mxu1 %v4416_v2 }
 0x15f   : > { %4034 = vmatmul.mubr.msk.f32.vlgmr.msra.gmra.mxu1 %vm853_vm2, %v4660_v26 }
 0x160   : > { %v1007_v38 = vpop.permute.xlu1 %1006  ;;  %4043 = vmatprep.mubr.msk.f32.mxu1 %vm4417_vm0, %v4416_v2 }
 0x161   : > { %4037 = vmatpush3.xpose.msk.msra.mxu0 %vm853_vm2, %v1007_v38 }
 0x162   : > { %4046 = vmatprep.subr.mxu0 %v4416_v2 }
 0x164   : > { %4039 = vmatmul.mubr.msk.f32.vlgmr.msra.gmra.mxu0 %vm853_vm2, %v4667_v30  ;;  %v1084_v39 = vpop.permute.xlu1 %1083 }
 0x165   : > { %4042 = vmatpush3.xpose.msk.msra.mxu1 %vm853_vm2, %v1084_v39  ;;  %4048 = vmatprep.mubr.msk.f32.mxu0 %vm4417_vm0, %v4416_v2 }
 0x166   : > { %4051 = vmatprep.subr.mxu1 %v4416_v2 }
 0x168   : > { %4044 = vmatmul.mubr.msk.f32.vlgmr.msra.gmra.mxu1 %vm853_vm2, %v4674_v34 }
 0x169   : > { %4053 = vmatprep.mubr.msk.f32.mxu1 %vm4417_vm0, %v4416_v2 }
 0x21b   : > { %v924_v41 = vpop.f32.mrf.mxu0 }
 0x21c   : > { %v1159_v42 = vmul.f32 0.35355338, %v924_v41  ;;  %v1520_v41 = vld [vmem:[%s5194_s5 + $0x18] sm:$0xff] }
 0x21d   : > { %v4030_v43 = vpop.f32.mrf.mxu0 }
 0x21e   : > { %v1165_v44 = vsel %vm521_vm3, %v1159_v42, -1e+09 }
 0x21f   : > { %v1001_v45 = vpop.f32.mrf.mxu1  ;;  %v1169_v46 = vsel %vm853_vm2, %v1165_v44, -inf }
 0x220   : > { %v1160_v47 = vmul.f32 0.35355338, %v1001_v45  ;;  %1170 = vmax.xlane.f32.xlu0 %v1169_v46 }
 0x221   : > { %v4035_v48 = vpop.f32.mrf.mxu1 }
 0x222   : > { %v1166_v49 = vsel %vm521_vm3, %v1160_v47, -1e+09 }
 0x223   : > { %v1172_v50 = vsel %vm853_vm2, %v1166_v49, -inf }
 0x224   : > { %v1078_v51 = vpop.f32.mrf.mxu0  ;;  %1173 = vmax.xlane.f32.xlu1 %v1172_v50 }
 0x225   : > { %v1161_v52 = vmul.f32 0.35355338, %v1078_v51 }
 0x226   : > { %v4040_v53 = vpop.f32.mrf.mxu0 }
 0x227   : > { %v1167_v54 = vsel %vm521_vm3, %v1161_v52, -1e+09 }
 0x228   : > { %v1155_v55 = vpop.f32.mrf.mxu1  ;;  %v1175_v56 = vsel %vm853_vm2, %v1167_v54, -inf }
 0x229   : > { %v1162_v57 = vmul.f32 0.35355338, %v1155_v55  ;;  %1176 = vmax.xlane.f32.xlu0 %v1175_v56 }
 0x22a   : > { %v4045_v58 = vpop.f32.mrf.mxu1 }
 0x22b   : > { %v1168_v59 = vsel %vm521_vm3, %v1162_v57, -1e+09 }
 0x22c   : > { %v1178_v60 = vsel %vm853_vm2, %v1168_v59, -inf }
 0x22d   : > { %1179 = vmax.xlane.f32.xlu0 %v1178_v60 }
 0x235   : > { %1213 = vrot.lane.b32.xlu1 %v4653_v22, %s4419_s24 }
 0x2a9   : > { %v1171_v61 = vpop.xlane.xlu0 %1170 }
 0x2aa   : > { %v1181_v62 = vsub.f32 %v1165_v44, %v1171_v61  ;;  %v3773_v61 = vld [vmem:[%s5195_s6] ss:$0 sm:$0xff] }
 0x2ac   : > { %v1185_v63 = vmul.f32 1.442695, %v1181_v62 }
 0x2ad   : > { %v1174_v0 = vpop.xlane.xlu1 %1173 }
 0x2ae   : > { %4304 = vpow2.f32 %v1185_v63  ;;  %v1182_v1 = vsub.f32 %v1166_v49, %v1174_v0 }
 0x2b0   : > { %v1187_v3 = vmul.f32 1.442695, %v1182_v1 }
 0x2b1   : > { %v1214_v4 = vpop.permute.xlu1 %1213 }
 0x2b2   : > { %4306 = vpow2.f32 %v1187_v3  ;;  %v1177_v5 = vpop.xlane.xlu0 %1176  ;;  %4047 = vmatpush3.msra.mxu0 %v1214_v4  ;;  %v1849_v4 = vld [vmem:[%s5197_s8 + $0x18] sm:$0xff] }
 0x2b3   : > { %v1183_v6 = vsub.f32 %v1167_v54, %v1177_v5  ;;  %4056 = vmatprep.subr.mxu0 %v4416_v2  ;;  %v1848_v5 = vld [vmem:[%s5197_s8 + $0x10] sm:$0xff] }
 0x2b5   : > { %v1189_v7 = vmul.f32 1.442695, %v1183_v6  ;;  %v1847_v6 = vld [vmem:[%s5197_s8 + $0x8] sm:$0xff] }
 0x2b6   : > { %v1180_v8 = vpop.xlane.xlu0 %1179 }
 0x2b7   : > { %4308 = vpow2.f32 %v1189_v7  ;;  %v1184_v9 = vsub.f32 %v1168_v59, %v1180_v8  ;;  %v1846_v7 = vld [vmem:[%s5197_s8] sm:$0xff] }
 0x2b9   : > { %v1191_v11 = vmul.f32 1.442695, %v1184_v9 }
 0x2bb   : > { %v4305_v12 = vpop.eup %4304  ;;  %4310 = vpow2.f32 %v1191_v11 }
 0x2bc   : > { %v1193_v13 = vsel %vm853_vm2, %v4305_v12, 0.0 }
 0x2bd   : > { %1194 = vadd.xlane.f32.xlu1 %v1193_v13  ;;  %v3774_v13 = vld [vmem:[%s5196_s7] ss:$0 sm:$0xff] }
 0x2bf   : > { %v4307_v14 = vpop.eup %4306 }
 0x2c0   : > { %v1196_v15 = vsel %vm853_vm2, %v4307_v14, 0.0 }
 0x2c1   : > { %1197 = vadd.xlane.f32.xlu0 %v1196_v15 }
 0x2c4   : > { %v4309_v16 = vpop.eup %4308 }
 0x2c5   : > { %v1199_v17 = vsel %vm853_vm2, %v4309_v16, 0.0 }
 0x2c6   : > { %1200 = vadd.xlane.f32.xlu1 %v1199_v17  ;;  %v1944_v17 = vld [vmem:[%s5199_s10 + $0x38] sm:$0xff] }
 0x2c8   : > { %v4311_v18 = vpop.eup %4310 }
 0x2c9   : > { %v1202_v19 = vsel %vm853_vm2, %v4311_v18, 0.0 }
 0x2ca   : > { %1203 = vadd.xlane.f32.xlu0 %v1202_v19  ;;  %v1941_v19 = vld [vmem:[%s5199_s10 + $0x20] sm:$0xff] }
 0x2d7   : > { %1365 = vrot.lane.b32.xlu1 %v4667_v30, %s4419_s24 }
 0x2db   : > { %1441 = vrot.lane.b32.xlu1 %v4674_v34, %s4419_s24 }
 0x2e0   : > { %1289 = vrot.lane.b32.xlu0 %v4660_v26, %s4419_s24 }
 0x346   : > { %v1195_v20 = vpop.xlane.xlu1 %1194 }
 0x347   : > { %4312 = vrcp.f32 %v1195_v20  ;;  %v1940_v20 = vld [vmem:[%s5199_s10 + $0x18] sm:$0xff] }
 0x34a   : > { %v1198_v21 = vpop.xlane.xlu0 %1197 }
 0x34b   : > { %4314 = vrcp.f32 %v1198_v21  ;;  %v1939_v21 = vld [vmem:[%s5199_s10 + $0x10] sm:$0xff] }
 0x34f   : > { %v1201_v22 = vpop.xlane.xlu1 %1200 }
 0x350   : > { %4316 = vrcp.f32 %v1201_v22  ;;  %v1938_v22 = vld [vmem:[%s5199_s10 + $0x8] sm:$0xff] }
 0x353   : > { %v1204_v23 = vpop.xlane.xlu0 %1203  ;;  %v1366_v25 = vpop.permute.xlu1 %1365 }
 0x354   : > { %v4313_v24 = vpop.eup %4312  ;;  %4318 = vrcp.f32 %v1204_v23  ;;  %v1937_v23 = vld [vmem:[%s5199_s10] sm:$0xff] }
 0x355   : > { %v1209_v27 = vmul.f32 %v4313_v24, %v4305_v12  ;;  %v3775_v24 = vld [vmem:[%s5198_s9] ss:$0 sm:$0xff] }
 0x357   : > { %v1290_v28 = vpop.permute.xlu0 %1289  ;;  %4049 = vmatmul.mubr.msk.f32.vlgmr.msra.gmra.mxu0 %vm853_vm2, %v1209_v27  ;;  %v1442_v30 = vpop.permute.xlu1 %1441 }
 0x358   : > { %v4315_v29 = vpop.eup %4314  ;;  %4052 = vmatpush3.msra.mxu1 %v1290_v28  ;;  %4057 = vmatpush3.msra.mxu0 %v1366_v25 }
 0x359   : > { %4061 = vmatprep.subr.mxu1 %v4416_v2  ;;  %v1210_v26 = vmul.f32 %v4315_v29, %v4307_v14  ;;  %4058 = vmatprep.mubr.msk.f32.mxu0 %vm4417_vm0, %v4416_v2 }
 0x35a   : > { %4066 = vmatprep.subr.mxu0 %v4416_v2 }
 0x35b   : > { %4054 = vmatmul.mubr.msk.f32.vlgmr.msra.gmra.mxu1 %vm853_vm2, %v1210_v26 }
 0x35c   : > { %4062 = vmatpush3.msra.mxu1 %v1442_v30  ;;  %4063 = vmatprep.mubr.msk.f32.mxu1 %vm4417_vm0, %v4416_v2 }
 0x35d   : > { %v4317_v31 = vpop.eup %4316  ;;  %4071 = vmatprep.subr.mxu1 %v4416_v2 }
 0x35e   : > { %v1211_v32 = vmul.f32 %v4317_v31, %v4309_v16 }
 0x360   : > { %4059 = vmatmul.mubr.msk.f32.vlgmr.msra.gmra.mxu0 %vm853_vm2, %v1211_v32 }
 0x361   : > { %v4319_v33 = vpop.eup %4318  ;;  %4068 = vmatprep.mubr.msk.f32.mxu0 %vm4417_vm0, %v4416_v2  ;;  %4067 = vmatpush3.msra.mxu0 %v1517_v35 }
 0x362   : > { %v1212_v34 = vmul.f32 %v4319_v33, %v4311_v18  ;;  %4076 = vmatprep.subr.mxu0 %v4416_v2  ;;  %v1943_v18 = vld [vmem:[%s5199_s10 + $0x30] sm:$0xff]  ;;  %v3778_v33 = vld [vmem:[%s5200_s11] ss:$0 sm:$0xff] }
 0x364   : > { %4064 = vmatmul.mubr.msk.f32.vlgmr.msra.gmra.mxu1 %vm853_vm2, %v1212_v34 }
 0x365   : > { %4073 = vmatprep.mubr.msk.f32.mxu1 %vm4417_vm0, %v4416_v2  ;;  %4072 = vmatpush3.msra.mxu1 %v1518_v36 }
 0x366   : > { %4081 = vmatprep.subr.mxu1 %v4416_v2 }
 0x417   : > { %v1285_v38 = vpop.f32.mrf.mxu0 }
 0x418   : > { %4069 = vmatmul.mubr.msk.f32.vlgmr.msra.gmra.mxu0 %vm853_vm2, %v1285_v38 }
 0x419   : > { %v4050_v39 = vpop.f32.mrf.mxu0  ;;  %4077 = vmatpush3.msra.mxu0 %v1519_v37  ;;  %4078 = vmatprep.mubr.msk.f32.mxu0 %vm4417_vm0, %v4416_v2 }
 0x41a   : > { %4086 = vmatprep.subr.mxu0 %v4416_v2  ;;  %v3784_v39 = vld [vmem:[%s5192_s3 + $0x98] sm:$0xff] }
 0x41b   : > { %v1361_v42 = vpop.f32.mrf.mxu1 }
 0x41c   : > { %4074 = vmatmul.mubr.msk.f32.vlgmr.msra.gmra.mxu1 %vm853_vm2, %v1361_v42  ;;  %v3783_v42 = vld [vmem:[%s5192_s3 + $0x90] sm:$0xff] }
 0x41d   : > { %v4055_v43 = vpop.f32.mrf.mxu1  ;;  %4082 = vmatpush3.msra.mxu1 %v1520_v41  ;;  %4083 = vmatprep.mubr.msk.f32.mxu1 %vm4417_vm0, %v4416_v2  ;;  %v3792_v41 = vld [vmem:[%s5192_s3 + $0xd8] sm:$0xff] }
 0x41e   : > { %4097 = vmatprep.subr.mxu1 %v4416_v2  ;;  %v3791_v43 = vld [vmem:[%s5192_s3 + $0xd0] sm:$0xff] }
 0x420   : > { %v1437_v44 = vpop.f32.mrf.mxu0 }
 0x421   : > { %4079 = vmatmul.mubr.msk.f32.vlgmr.msra.gmra.mxu0 %vm853_vm2, %v1437_v44  ;;  %v3782_v44 = vld [vmem:[%s5192_s3 + $0x88] sm:$0xff] }
 0x422   : > { %v4060_v45 = vpop.f32.mrf.mxu0  ;;  %4094 = vmatprep.mubr.msk.f32.mxu0 %vm4417_vm0, %v4416_v2  ;;  %4087 = vmatpush3.msra.mxu0 %v1849_v4 }
 0x423   : > { %4088 = vmatprep.subr.mxu0 %v4416_v2  ;;  %v3790_v45 = vld [vmem:[%s5192_s3 + $0xc8] sm:$0xff] }
 0x424   : > { %v1513_v46 = vpop.f32.mrf.mxu1  ;;  %4089 = vmatpush3.msra.mxu0 %v1848_v5  ;;  %v3803_v5 = vld [vmem:[%s5193_s4 + $0x6] ss:$0 sm:$0xff] }
 0x425   : > { %4084 = vmatmul.mubr.msk.f32.vlgmr.msra.gmra.mxu1 %vm853_vm2, %v1513_v46  ;;  %4090 = vmatprep.subr.mxu0 %v4416_v2  ;;  %v3781_v46 = vld [vmem:[%s5192_s3 + $0x80] sm:$0xff] }
 0x426   : > { %v4065_v47 = vpop.f32.mrf.mxu1  ;;  %4113 = vmatprep.mubr.msk.f32.mxu1 %vm4417_vm0, %v4416_v2  ;;  %4091 = vmatpush3.msra.mxu0 %v1847_v6 }
 0x427   : > { %4092 = vmatprep.subr.mxu0 %v4416_v2  ;;  %4098 = vmatpush3.msra.mxu1 %v1944_v17  ;;  %v3789_v47 = vld [vmem:[%s5192_s3 + $0xc0] sm:$0xff] }
 0x428   : > { %4093 = vmatpush3.msra.mxu0 %v1846_v7  ;;  %4099 = vmatprep.subr.mxu1 %v4416_v2 }
 0x429   : > { %4116 = vmatprep.subr.mxu0 %v4416_v2  ;;  %4100 = vmatpush3.msra.mxu1 %v1943_v18 }
 0x42a   : > { %4101 = vmatprep.subr.mxu1 %v4416_v2 }
 0x4d8   : > { %v1590_v48 = vpop.f32.mrf.mxu0 }
 0x4d9   : > { %v1813_v54 = vsel %vm566_vm1, %v1590_v48, 0.0 }
 0x4da   : > { %v4070_v49 = vpop.f32.mrf.mxu0 }
 0x4dc   : > { %v1663_v50 = vpop.f32.mrf.mxu1 }
 0x4dd   : > { %v1814_v52 = vsel %vm566_vm1, %v1663_v50, 0.0 }
 0x4de   : > { %v4075_v51 = vpop.f32.mrf.mxu1  ;;  %v1815_v56 = vadd.f32 %v1814_v52, %v1813_v54  ;;  %v3780_v52 = vld [vmem:[%s5201_s12] ss:$0 sm:$0xff] }
 0x4e1   : > { %v1736_v53 = vpop.f32.mrf.mxu0 }
 0x4e2   : > { %v1816_v55 = vsel %vm566_vm1, %v1736_v53, 0.0 }
 0x4e3   : > { %v4080_v57 = vpop.f32.mrf.mxu0  ;;  %v1817_v58 = vadd.f32 %v1816_v55, %v1815_v56  ;;  %v3788_v56 = vld [vmem:[%s5192_s3 + $0xb8] sm:$0xff] }
 0x4e4   : > { %v3787_v57 = vld [vmem:[%s5192_s3 + $0xb0] sm:$0xff] }
 0x4e5   : > { %v1809_v59 = vpop.f32.mrf.mxu1 }
 0x4e6   : > { %v1818_v60 = vsel %vm566_vm1, %v1809_v59, 0.0  ;;  %v3785_v59 = vld [vmem:[%s5192_s3 + $0xa0] sm:$0xff] }
 0x4e7   : > { %v1819_v62 = vadd.f32 %v1818_v60, %v1817_v58  ;;  %v4085_v63 = vpop.f32.mrf.mxu1  ;;  %v3786_v58 = vld [vmem:[%s5192_s3 + $0xa8] sm:$0xff]  ;;  %v3796_v60 = vld [vmem:[%s5192_s3 + $0xf8] sm:$0xff] }
 0x4e8   : > { %v3793_v63 = vld [vmem:[%s5192_s3 + $0xe0] sm:$0xff] }
 0x4e9   : > { %v1827_v0 = vadd.f32 %v3773_v61, %v1819_v62  ;;  %v3795_v61 = vld [vmem:[%s5192_s3 + $0xf0] sm:$0xff]  ;;  %v3794_v62 = vld [vmem:[%s5192_s3 + $0xe8] sm:$0xff] }
 0x4eb   : > { %v1828_v1 = vmul.f32 %v1827_v0, %v1827_v0 }
 0x4ed   : > { %v1829_v3 = vsel %vm566_vm1, %v1828_v1, 0.0 }
 0x4ee   : > { %1830 = vadd.xlane.f32.xlu0 %v1829_v3 }
 0x577   : > { %v1831_v8 = vpop.xlane.xlu0 %1830 }
 0x578   : > { %v1833_v9 = vmul.f32 0.03125, %v1831_v8 }
 0x57a   : > { %v1834_v11 = vadd.f32 1e-06, %v1833_v9  ;;  %v3802_v9 = vld [vmem:[%s5193_s4 + $0x5] ss:$0 sm:$0xff] }
 0x57c   : > { %4320 = vrsqrt.f32 %v1834_v11 }
 0x589   : > { %v4321_v12 = vpop.eup %4320 }
 0x58a   : > { %v1836_v14 = vmul.f32 %v4321_v12, %v1827_v0  ;;  %v3801_v0 = vld [vmem:[%s5193_s4 + $0x4] ss:$0 sm:$0xff] }
 0x58c   : > { %v1844_v15 = vmul.f32 %v3774_v13, %v1836_v14  ;;  %v3804_v14 = vld [vmem:[%s5193_s4 + $0x7] ss:$0 sm:$0xff] }
 0x58e   : > { %v4804_v16 = vadd.f32 %v1844_v15, %v4592_v10  ;;  %v1942_v10 = vld [vmem:[%s5199_s10 + $0x28] sm:$0xff] }
 0x58f   : > { %4102 = vmatpush3.msra.mxu1 %v1942_v10 }
 0x590   : > { %4095 = vmatmul.mubr.msk.f32.vlgmr.msra.gmra.mxu0 %vm566_vm1, %v4804_v16  ;;  %4103 = vmatprep.subr.mxu1 %v4416_v2 }
 0x591   : > { %4124 = vmatprep.mubr.msk.f32.mxu0 %vm4417_vm0, %v4416_v2  ;;  %4104 = vmatpush3.msra.mxu1 %v1941_v19 }
 0x592   : > { %4105 = vmatprep.subr.mxu1 %v4416_v2  ;;  %4117 = vmatpush3.msra.mxu0 %v3784_v39 }
 0x593   : > { %4106 = vmatpush3.msra.mxu1 %v1940_v20  ;;  %4118 = vmatprep.subr.mxu0 %v4416_v2 }
 0x594   : > { %4107 = vmatprep.subr.mxu1 %v4416_v2  ;;  %4119 = vmatpush3.msra.mxu0 %v3783_v42 }
 0x595   : > { %4108 = vmatpush3.msra.mxu1 %v1939_v21  ;;  %4120 = vmatprep.subr.mxu0 %v4416_v2 }
 0x596   : > { %4109 = vmatprep.subr.mxu1 %v4416_v2  ;;  %4121 = vmatpush3.msra.mxu0 %v3782_v44 }
 0x597   : > { %4110 = vmatpush3.msra.mxu1 %v1938_v22  ;;  %4122 = vmatprep.subr.mxu0 %v4416_v2 }
 0x598   : > { %4111 = vmatprep.subr.mxu1 %v4416_v2  ;;  %4123 = vmatpush3.msra.mxu0 %v3781_v46 }
 0x599   : > { %4112 = vmatpush3.msra.mxu1 %v1937_v23  ;;  %4127 = vmatprep.subr.mxu0 %v4416_v2 }
 0x59a   : > { %4138 = vmatprep.subr.mxu1 %v4416_v2 }
 0x650   : > { %v1926_v25 = vpop.f32.mrf.mxu0 }
 0x651   : > { %v1927_v27 = vadd.f32 %v3775_v24, %v1926_v25 }
 0x652   : > { %v4096_v28 = vpop.f32.mrf.mxu0 }
 0x653   : > { %v3777_v29 = vmul.f32 -1.442695, %v1927_v27 }
 0x655   : > { %4322 = vpow2.f32 %v3777_v29 }
 0x662   : > { %v4323_v26 = vpop.eup %4322 }
 0x663   : > { %v1933_v30 = vadd.f32 1.0, %v4323_v26 }
 0x665   : > { %4324 = vrcp.f32 %v1933_v30 }
 0x672   : > { %v4325_v31 = vpop.eup %4324 }
 0x673   : > { %v1936_v32 = vmul.f32 %v4325_v31, %v1927_v27 }
 0x675   : > { %4114 = vmatmul.mubr.msk.f32.vlgmr.msra.gmra.mxu1 %vm1952_vm4, %v1936_v32 }
 0x676   : > { %4146 = vmatprep.mubr.msk.f32.mxu1 %vm4417_vm0, %v4416_v2  ;;  %4139 = vmatpush3.msra.mxu1 %v3792_v41 }
 0x677   : > { %4140 = vmatprep.subr.mxu1 %v4416_v2 }
 0x678   : > { %4141 = vmatpush3.msra.mxu1 %v3791_v43 }
 0x679   : > { %4142 = vmatprep.subr.mxu1 %v4416_v2 }
 0x67a   : > { %4143 = vmatpush3.msra.mxu1 %v3790_v45 }
 0x67b   : > { %4144 = vmatprep.subr.mxu1 %v4416_v2 }
 0x67c   : > { %4145 = vmatpush3.msra.mxu1 %v3789_v47 }
 0x67d   : > { %4160 = vmatprep.subr.mxu1 %v4416_v2 }
 0x735   : > { %v2022_v34 = vpop.f32.mrf.mxu1 }
 0x736   : > { %v2023_v35 = vadd.f32 %v3778_v33, %v2022_v34 }
 0x737   : > { %v4115_v36 = vpop.f32.mrf.mxu1 }
 0x738   : > { %v2026_v37 = vmul.f32 %v2023_v35, %v2023_v35 }
 0x73a   : > { %v2027_v38 = vsel %vm566_vm1, %v2026_v37, 0.0 }
 0x73b   : > { %2028 = vadd.xlane.f32.xlu1 %v2027_v38 }
 0x7c4   : > { %v2029_v48 = vpop.xlane.xlu1 %2028 }
 0x7c5   : > { %v2030_v49 = vmul.f32 0.03125, %v2029_v48 }
 0x7c7   : > { %v2031_v50 = vadd.f32 1e-06, %v2030_v49 }
 0x7c9   : > { %4326 = vrsqrt.f32 %v2031_v50 }
 0x7d6   : > { %v4327_v51 = vpop.eup %4326 }
 0x7d7   : > { %v2033_v53 = vmul.f32 %v4327_v51, %v2023_v35 }
 0x7d9   : > { %v2041_v54 = vmul.f32 %v3780_v52, %v2033_v53 }
 0x7db   : > { %v4888_v55 = vadd.f32 %v2041_v54, %v4804_v16 }
 0x7dd   : > { %4125 = vmatmul.mubr.msk.f32.vlgmr.msra.gmra.mxu0 %vm566_vm1, %v4888_v55  ;;  %4147 = vmatmul.mubr.msk.f32.vlgmr.msra.gmra.mxu1 %vm566_vm1, %v4888_v55 }
 0x7de   : > { %4128 = vmatpush3.msra.mxu0 %v3788_v56  ;;  %4135 = vmatprep.mubr.msk.f32.mxu0 %vm4417_vm0, %v4416_v2 }
 0x7df   : > { %4129 = vmatprep.subr.mxu0 %v4416_v2  ;;  %4162 = vmatprep.mubr.msk.f32.mxu1 %vm4417_vm0, %v4416_v2 }
 0x7e0   : > { %4130 = vmatpush3.msra.mxu0 %v3787_v57 }
 0x7e1   : > { %4131 = vmatprep.subr.mxu0 %v4416_v2 }
 0x7e2   : > { %4132 = vmatpush3.msra.mxu0 %v3786_v58 }
 0x7e3   : > { %4133 = vmatprep.subr.mxu0 %v4416_v2 }
 0x7e4   : > { %4134 = vmatpush3.msra.mxu0 %v3785_v59 }
 0x7e5   : > { %4136 = vmatmul.mubr.msk.f32.vlgmr.msra.gmra.mxu0 %vm566_vm1, %v4888_v55  ;;  %4149 = vmatprep.subr.mxu0 %v4416_v2 }
 0x7e6   : > { %4150 = vmatpush3.msra.mxu0 %v3796_v60  ;;  %4157 = vmatprep.mubr.msk.f32.mxu0 %vm4417_vm0, %v4416_v2 }
 0x7e7   : > { %4151 = vmatprep.subr.mxu0 %v4416_v2 }
 0x7e8   : > { %4152 = vmatpush3.msra.mxu0 %v3795_v61 }
 0x7e9   : > { %4153 = vmatprep.subr.mxu0 %v4416_v2 }
 0x7ea   : > { %4154 = vmatpush3.msra.mxu0 %v3794_v62 }
 0x7eb   : > { %4155 = vmatprep.subr.mxu0 %v4416_v2 }
 0x7ec   : > { %4156 = vmatpush3.msra.mxu0 %v3793_v63 }
 0x7ed   : > { %4158 = vmatmul.mubr.msk.f32.vlgmr.msra.gmra.mxu0 %vm566_vm1, %v4888_v55  ;;  %4170 = vmatprep.subr.mxu0 %v4416_v2 }
 0x7ee   : > { %4172 = vmatprep.mubr.msk.f32.mxu0 %vm4417_vm0, %v4416_v2 }
 0x89d   : > { %v2158_v1 = vpop.f32.mrf.mxu0  ;;  %v2298_v3 = vpop.f32.mrf.mxu1 }
 0x89e   : > { %v2159_v4 = vadd.f32 %v3801_v0, %v2158_v1  ;;  %v4945_v8 = vadd.f32 %v3803_v5, %v2298_v3 }
 0x89f   : > { %v4126_v6 = vpop.f32.mrf.mxu0  ;;  %v4148_v7 = vpop.f32.mrf.mxu1 }
 0x8a0   : > { %2373 = vrot.lane.b32.xlu0 %v2159_v4, %s4418_s19 }
 0x8a4   : > { %2527 = vrot.lane.b32.xlu0 %v4945_v8, %s4418_s19 }
 0x8a5   : > { %v2228_v11 = vpop.f32.mrf.mxu0 }
 0x8a6   : > { %v4952_v12 = vadd.f32 %v3802_v9, %v2228_v11 }
 0x8a7   : > { %v4137_v13 = vpop.f32.mrf.mxu0 }
 0x8a8   : > { %2450 = vrot.lane.b32.xlu1 %v4952_v12, %s4418_s19 }
 0x8ad   : > { %v2368_v15 = vpop.f32.mrf.mxu0 }
 0x8ae   : > { %v4959_v16 = vadd.f32 %v3804_v14, %v2368_v15 }
 0x8af   : > { %v4159_v17 = vpop.f32.mrf.mxu0 }
 0x8b0   : > { %2604 = vrot.lane.b32.xlu1 %v4959_v16, %s4418_s19  ;;  %v3822_v17 = vld [vmem:[%s5194_s5 + $0x28] sm:$0xff] }
 0x912   : > { %v2374_v18 = vpop.permute.xlu0 %2373 }
 0x913   : > { %4161 = vmatpush3.xpose.msk.msra.mxu1 %vm853_vm2, %v2374_v18  ;;  %v3823_v18 = vld [vmem:[%s5194_s5 + $0x30] sm:$0xff] }
 0x914   : > { %4165 = vmatprep.subr.mxu1 %v4416_v2 }
 0x916   : > { %4163 = vmatmul.mubr.msk.f32.vlgmr.msra.gmra.mxu1 %vm853_vm2, %v2159_v4  ;;  %v2528_v10 = vpop.permute.xlu0 %2527 }
 0x917   : > { %4171 = vmatpush3.xpose.msk.msra.mxu0 %vm853_vm2, %v2528_v10  ;;  %4167 = vmatprep.mubr.msk.f32.mxu1 %vm4417_vm0, %v4416_v2 }
 0x918   : > { %4180 = vmatprep.subr.mxu0 %v4416_v2 }
 0x91a   : > { %v2451_v19 = vpop.permute.xlu1 %2450  ;;  %4173 = vmatmul.mubr.msk.f32.vlgmr.msra.gmra.mxu0 %vm853_vm2, %v4945_v8 }
 0x91b   : > { %4166 = vmatpush3.xpose.msk.msra.mxu1 %vm853_vm2, %v2451_v19  ;;  %4182 = vmatprep.mubr.msk.f32.mxu0 %vm4417_vm0, %v4416_v2 }
 0x91c   : > { %4175 = vmatprep.subr.mxu1 %v4416_v2 }
 0x91e   : > { %4168 = vmatmul.mubr.msk.f32.vlgmr.msra.gmra.mxu1 %vm853_vm2, %v4952_v12 }
 0x91f   : > { %4177 = vmatprep.mubr.msk.f32.mxu1 %vm4417_vm0, %v4416_v2 }
 0x922   : > { %v2605_v20 = vpop.permute.xlu1 %2604 }
 0x923   : > { %4176 = vmatpush3.xpose.msk.msra.mxu1 %vm853_vm2, %v2605_v20 }
 0x924   : > { %4185 = vmatprep.subr.mxu1 %v4416_v2 }
 0x926   : > { %4178 = vmatmul.mubr.msk.f32.vlgmr.msra.gmra.mxu1 %vm853_vm2, %v4959_v16 }
 0x927   : > { %4187 = vmatprep.mubr.msk.f32.mxu1 %vm4417_vm0, %v4416_v2 }
 0x9d6   : > { %v2445_v21 = vpop.f32.mrf.mxu1 }
 0x9d7   : > { %v2680_v22 = vmul.f32 0.35355338, %v2445_v21 }
 0x9d8   : > { %v4164_v23 = vpop.f32.mrf.mxu1 }
 0x9d9   : > { %v2684_v24 = vsel %vm521_vm3, %v2680_v22, -1e+09  ;;  %v3824_v22 = vld [vmem:[%s5194_s5 + $0x38] sm:$0xff] }
 0x9da   : > { %v2599_v25 = vpop.f32.mrf.mxu0  ;;  %v2688_v27 = vsel %vm853_vm2, %v2684_v24, -inf }
 0x9db   : > { %v2682_v28 = vmul.f32 0.35355338, %v2599_v25  ;;  %2689 = vmax.xlane.f32.xlu0 %v2688_v27 }
 0x9dc   : > { %v4174_v29 = vpop.f32.mrf.mxu0 }
 0x9dd   : > { %v2686_v26 = vsel %vm521_vm3, %v2682_v28, -1e+09 }
 0x9de   : > { %v2522_v30 = vpop.f32.mrf.mxu1  ;;  %v2694_v31 = vsel %vm853_vm2, %v2686_v26, -inf }
 0x9df   : > { %v2681_v32 = vmul.f32 0.35355338, %v2522_v30  ;;  %2695 = vmax.xlane.f32.xlu0 %v2694_v31 }
 0x9e0   : > { %v4169_v33 = vpop.f32.mrf.mxu1 }
 0x9e1   : > { %v2685_v34 = vsel %vm521_vm3, %v2681_v32, -1e+09 }
 0x9e2   : > { %v2691_v35 = vsel %vm853_vm2, %v2685_v34, -inf }
 0x9e3   : > { %2692 = vmax.xlane.f32.xlu1 %v2691_v35 }
 0x9e6   : > { %v2676_v36 = vpop.f32.mrf.mxu1 }
 0x9e7   : > { %v2683_v37 = vmul.f32 0.35355338, %v2676_v36 }
 0x9e8   : > { %v4179_v38 = vpop.f32.mrf.mxu1 }
 0x9e9   : > { %v2687_v39 = vsel %vm521_vm3, %v2683_v37, -1e+09 }
 0x9ea   : > { %v2697_v41 = vsel %vm853_vm2, %v2687_v39, -inf }
 0x9eb   : > { %2698 = vmax.xlane.f32.xlu0 %v2697_v41  ;;  %v3830_v41 = vld [vmem:[%s5195_s6 + $0x1] ss:$0 sm:$0xff] }
 0x9f4   : > { %2732 = vrot.lane.b32.xlu1 %v2159_v4, %s4419_s24 }
 0xa64   : > { %v2690_v42 = vpop.xlane.xlu0 %2689 }
 0xa65   : > { %v2700_v43 = vsub.f32 %v2684_v24, %v2690_v42 }
 0xa67   : > { %v2704_v44 = vmul.f32 1.442695, %v2700_v43 }
 0xa68   : > { %v2696_v45 = vpop.xlane.xlu0 %2695 }
 0xa69   : > { %4328 = vpow2.f32 %v2704_v44  ;;  %v2702_v46 = vsub.f32 %v2686_v26, %v2696_v45 }
 0xa6b   : > { %v2708_v47 = vmul.f32 1.442695, %v2702_v46 }
 0xa6c   : > { %v2693_v48 = vpop.xlane.xlu1 %2692 }
 0xa6d   : > { %4330 = vpow2.f32 %v2708_v47  ;;  %v2701_v49 = vsub.f32 %v2685_v34, %v2693_v48  ;;  %v3836_v47 = vld [vmem:[%s5197_s8 + $0x38] sm:$0xff]  ;;  %v3835_v48 = vld [vmem:[%s5197_s8 + $0x30] sm:$0xff] }
 0xa6f   : > { %v2706_v50 = vmul.f32 1.442695, %v2701_v49  ;;  %v3834_v49 = vld [vmem:[%s5197_s8 + $0x28] sm:$0xff] }
 0xa70   : > { %v2733_v51 = vpop.permute.xlu1 %2732 }
 0xa71   : > { %4332 = vpow2.f32 %v2706_v50  ;;  %4181 = vmatpush3.msra.mxu0 %v2733_v51  ;;  %v3833_v50 = vld [vmem:[%s5197_s8 + $0x20] sm:$0xff] }
 0xa72   : > { %4190 = vmatprep.subr.mxu0 %v4416_v2 }
 0xa74   : > { %v2699_v40 = vpop.xlane.xlu0 %2698 }
 0xa75   : > { %v2703_v52 = vsub.f32 %v2687_v39, %v2699_v40 }
 0xa76   : > { %v4329_v53 = vpop.eup %4328 }
 0xa77   : > { %v2710_v54 = vmul.f32 1.442695, %v2703_v52  ;;  %v2712_v56 = vsel %vm853_vm2, %v4329_v53, 0.0 }
 0xa78   : > { %2713 = vadd.xlane.f32.xlu1 %v2712_v56 }
 0xa79   : > { %4334 = vpow2.f32 %v2710_v54  ;;  %v3832_v54 = vld [vmem:[%s5196_s7 + $0x1] ss:$0 sm:$0xff] }
 0xa7a   : > { %v4331_v57 = vpop.eup %4330 }
 0xa7b   : > { %v2718_v58 = vsel %vm853_vm2, %v4331_v57, 0.0 }
 0xa7c   : > { %2719 = vadd.xlane.f32.xlu1 %v2718_v58 }
 0xa7e   : > { %v4333_v59 = vpop.eup %4332 }
 0xa7f   : > { %v2715_v60 = vsel %vm853_vm2, %v4333_v59, 0.0 }
 0xa80   : > { %2716 = vadd.xlane.f32.xlu0 %v2715_v60  ;;  %v3847_v60 = vld [vmem:[%s5199_s10 + $0x70] sm:$0xff] }
 0xa86   : > { %v4335_v61 = vpop.eup %4334 }
 0xa87   : > { %v2721_v62 = vsel %vm853_vm2, %v4335_v61, 0.0 }
 0xa88   : > { %2722 = vadd.xlane.f32.xlu0 %v2721_v62  ;;  %v3844_v62 = vld [vmem:[%s5199_s10 + $0x58] sm:$0xff] }
 0xa8d   : > { %2884 = vrot.lane.b32.xlu1 %v4945_v8, %s4419_s24 }
 0xa91   : > { %2960 = vrot.lane.b32.xlu1 %v4959_v16, %s4419_s24  ;;  %v3821_v16 = vld [vmem:[%s5194_s5 + $0x20] sm:$0xff] }
 0xa9e   : > { %2808 = vrot.lane.b32.xlu0 %v4952_v12, %s4419_s24  ;;  %s5154_s24 = scalar_lea.hbm %s5205_s16, %s3858_s17 }
 0xb01   : > { %v2714_v63 = vpop.xlane.xlu1 %2713 }
 0xb02   : > { %4336 = vrcp.f32 %v2714_v63  ;;  %v3843_v63 = vld [vmem:[%s5199_s10 + $0x50] sm:$0xff] }
 0xb05   : > { %v2720_v0 = vpop.xlane.xlu1 %2719 }
 0xb06   : > { %4338 = vrcp.f32 %v2720_v0  ;;  %v3842_v0 = vld [vmem:[%s5199_s10 + $0x48] sm:$0xff] }
 0xb09   : > { %v2717_v1 = vpop.xlane.xlu0 %2716  ;;  %v2885_v6 = vpop.permute.xlu1 %2884 }
 0xb0a   : > { %4340 = vrcp.f32 %v2717_v1  ;;  %v3841_v1 = vld [vmem:[%s5199_s10 + $0x40] sm:$0xff] }
 0xb0d   : > { %v2961_v13 = vpop.permute.xlu1 %2960 }
 0xb0f   : > { %v4337_v3 = vpop.eup %4336 }
 0xb10   : > { %v2728_v4 = vmul.f32 %v4337_v3, %v4329_v53  ;;  %v3838_v3 = vld [vmem:[%s5198_s9 + $0x1] ss:$0 sm:$0xff] }
 0xb11   : > { %v2723_v5 = vpop.xlane.xlu0 %2722 }
 0xb12   : > { %4342 = vrcp.f32 %v2723_v5  ;;  %4183 = vmatmul.mubr.msk.f32.vlgmr.msra.gmra.mxu0 %vm853_vm2, %v2728_v4 }
 0xb13   : > { %v4339_v7 = vpop.eup %4338  ;;  %4191 = vmatpush3.msra.mxu0 %v2885_v6  ;;  %4192 = vmatprep.mubr.msk.f32.mxu0 %vm4417_vm0, %v4416_v2 }
 0xb14   : > { %v2730_v8 = vmul.f32 %v4339_v7, %v4331_v57  ;;  %4200 = vmatprep.subr.mxu0 %v4416_v2 }
 0xb15   : > { %v2809_v9 = vpop.permute.xlu0 %2808 }
 0xb16   : > { %4186 = vmatpush3.msra.mxu1 %v2809_v9  ;;  %4193 = vmatmul.mubr.msk.f32.vlgmr.msra.gmra.mxu0 %vm853_vm2, %v2730_v8 }
 0xb17   : > { %v4341_v11 = vpop.eup %4340  ;;  %4195 = vmatprep.subr.mxu1 %v4416_v2  ;;  %4202 = vmatprep.mubr.msk.f32.mxu0 %vm4417_vm0, %v4416_v2 }
 0xb18   : > { %v2729_v12 = vmul.f32 %v4341_v11, %v4333_v59  ;;  %4201 = vmatpush3.msra.mxu0 %v3821_v16  ;;  %v3848_v59 = vld [vmem:[%s5199_s10 + $0x78] sm:$0xff] }
 0xb19   : > { %4210 = vmatprep.subr.mxu0 %v4416_v2 }
 0xb1a   : > { %4188 = vmatmul.mubr.msk.f32.vlgmr.msra.gmra.mxu1 %vm853_vm2, %v2729_v12 }
 0xb1b   : > { %4196 = vmatpush3.msra.mxu1 %v2961_v13  ;;  %4197 = vmatprep.mubr.msk.f32.mxu1 %vm4417_vm0, %v4416_v2  ;;  %v3850_v13 = vld [vmem:[%s5200_s11 + $0x1] ss:$0 sm:$0xff] }
 0xb1c   : > { %4205 = vmatprep.subr.mxu1 %v4416_v2 }
 0xb1f   : > { %v4343_v14 = vpop.eup %4342 }
 0xb20   : > { %v2731_v15 = vmul.f32 %v4343_v14, %v4335_v61  ;;  %v3845_v61 = vld [vmem:[%s5199_s10 + $0x60] sm:$0xff] }
 0xb22   : > { %4198 = vmatmul.mubr.msk.f32.vlgmr.msra.gmra.mxu1 %vm853_vm2, %v2731_v15 }
 0xb23   : > { %4207 = vmatprep.mubr.msk.f32.mxu1 %vm4417_vm0, %v4416_v2  ;;  %4206 = vmatpush3.msra.mxu1 %v3822_v17 }
 0xb24   : > { %4215 = vmatprep.subr.mxu1 %v4416_v2 }
 0xbd2   : > { %v2804_v10 = vpop.f32.mrf.mxu0 }
 0xbd3   : > { %4203 = vmatmul.mubr.msk.f32.vlgmr.msra.gmra.mxu0 %vm853_vm2, %v2804_v10 }
 0xbd4   : > { %v4184_v19 = vpop.f32.mrf.mxu0  ;;  %4211 = vmatpush3.msra.mxu0 %v3823_v18  ;;  %4212 = vmatprep.mubr.msk.f32.mxu0 %vm4417_vm0, %v4416_v2 }
 0xbd5   : > { %4220 = vmatprep.subr.mxu0 %v4416_v2 }
 0xbd6   : > { %v2956_v20 = vpop.f32.mrf.mxu0 }
 0xbd7   : > { %4213 = vmatmul.mubr.msk.f32.vlgmr.msra.gmra.mxu0 %vm853_vm2, %v2956_v20 }
 0xbd8   : > { %v4194_v21 = vpop.f32.mrf.mxu0  ;;  %4228 = vmatprep.mubr.msk.f32.mxu0 %vm4417_vm0, %v4416_v2  ;;  %4221 = vmatpush3.msra.mxu0 %v3836_v47 }
 0xbd9   : > { %4222 = vmatprep.subr.mxu0 %v4416_v2 }
 0xbda   : > { %v2880_v23 = vpop.f32.mrf.mxu1  ;;  %4223 = vmatpush3.msra.mxu0 %v3835_v48 }
 0xbdb   : > { %4208 = vmatmul.mubr.msk.f32.vlgmr.msra.gmra.mxu1 %vm853_vm2, %v2880_v23  ;;  %4224 = vmatprep.subr.mxu0 %v4416_v2 }
 0xbdc   : > { %v4189_v24 = vpop.f32.mrf.mxu1  ;;  %4216 = vmatpush3.msra.mxu1 %v3824_v22  ;;  %4217 = vmatprep.mubr.msk.f32.mxu1 %vm4417_vm0, %v4416_v2  ;;  %v3853_v22 = vld [vmem:[%s5201_s12 + $0x1] ss:$0 sm:$0xff] }
 0xbdd   : > { %4231 = vmatprep.subr.mxu1 %v4416_v2  ;;  %4225 = vmatpush3.msra.mxu0 %v3834_v49 }
 0xbde   : > { %4226 = vmatprep.subr.mxu0 %v4416_v2 }
 0xbdf   : > { %4227 = vmatpush3.msra.mxu0 %v3833_v50 }
 0xbe0   : > { %4250 = vmatprep.subr.mxu0 %v4416_v2 }
 0xbe2   : > { %v3032_v25 = vpop.f32.mrf.mxu1 }
 0xbe3   : > { %4218 = vmatmul.mubr.msk.f32.vlgmr.msra.gmra.mxu1 %vm853_vm2, %v3032_v25 }
 0xbe4   : > { %v4199_v27 = vpop.f32.mrf.mxu1  ;;  %4247 = vmatprep.mubr.msk.f32.mxu1 %vm4417_vm0, %v4416_v2  ;;  %4232 = vmatpush3.msra.mxu1 %v3848_v59 }
 0xbe5   : > { %4233 = vmatprep.subr.mxu1 %v4416_v2 }
 0xbe6   : > { %4234 = vmatpush3.msra.mxu1 %v3847_v60 }
 0xbe7   : > { %4235 = vmatprep.subr.mxu1 %v4416_v2 }
 0xc93   : > { %v3110_v28 = vpop.f32.mrf.mxu0 }
 0xc94   : > { %v3333_v34 = vsel %vm566_vm1, %v3110_v28, 0.0 }
 0xc95   : > { %v4204_v29 = vpop.f32.mrf.mxu0 }
 0xc96   : > { %v3587_v29 = vld [vmem:[%s5203_s14 + $0x18] sm:$0xff] }
 0xc97   : > { %v3256_v26 = vpop.f32.mrf.mxu0 }
 0xc98   : > { %v3336_v36 = vsel %vm566_vm1, %v3256_v26, 0.0  ;;  %v3586_v26 = vld [vmem:[%s5203_s14 + $0x10] sm:$0xff] }
 0xc99   : > { %v4214_v30 = vpop.f32.mrf.mxu0 }
 0xc9a   : > { %v3585_v30 = vld [vmem:[%s5203_s14 + $0x8] sm:$0xff] }
 0xc9b   : > { %v3183_v31 = vpop.f32.mrf.mxu1 }
 0xc9c   : > { %v3334_v32 = vsel %vm566_vm1, %v3183_v31, 0.0  ;;  %v3584_v31 = vld [vmem:[%s5203_s14] sm:$0xff] }
 0xc9d   : > { %v4209_v33 = vpop.f32.mrf.mxu1  ;;  %v3335_v35 = vadd.f32 %v3334_v32, %v3333_v34 }
 0xc9f   : > { %v3337_v38 = vadd.f32 %v3336_v36, %v3335_v35  ;;  %v3854_v36 = vld [vmem:[%s5202_s13] ss:$0 sm:$0xff] }
 0xca3   : > { %v3329_v37 = vpop.f32.mrf.mxu1 }
 0xca4   : > { %v3338_v39 = vsel %vm566_vm1, %v3329_v37, 0.0 }
 0xca5   : > { %v3339_v42 = vadd.f32 %v3338_v39, %v3337_v38  ;;  %v4219_v43 = vpop.f32.mrf.mxu1 }
 0xca7   : > { %v3348_v44 = vadd.f32 %v3830_v41, %v3339_v42 }
 0xca9   : > { %v3349_v45 = vmul.f32 %v3348_v44, %v3348_v44 }
 0xcab   : > { %v3350_v46 = vsel %vm566_vm1, %v3349_v45, 0.0 }
 0xcac   : > { %3351 = vadd.xlane.f32.xlu0 %v3350_v46 }
 0xd35   : > { %v3352_v51 = vpop.xlane.xlu0 %3351 }
 0xd36   : > { %v3353_v40 = vmul.f32 0.03125, %v3352_v51 }
 0xd38   : > { %v3354_v52 = vadd.f32 1e-06, %v3353_v40 }
 0xd3a   : > { %4344 = vrsqrt.f32 %v3354_v52 }
 0xd47   : > { %v4345_v53 = vpop.eup %4344 }
 0xd48   : > { %v3356_v56 = vmul.f32 %v4345_v53, %v3348_v44 }
 0xd4a   : > { %v3365_v57 = vmul.f32 %v3832_v54, %v3356_v56 }
 0xd4c   : > { %v3366_v58 = vadd.f32 %v3365_v57, %v4888_v55  ;;  %v3846_v55 = vld [vmem:[%s5199_s10 + $0x68] sm:$0xff] }
 0xd4d   : > { %4236 = vmatpush3.msra.mxu1 %v3846_v55 }
 0xd4e   : > { %4229 = vmatmul.mubr.msk.f32.vlgmr.msra.gmra.mxu0 %vm566_vm1, %v3366_v58  ;;  %4237 = vmatprep.subr.mxu1 %v4416_v2 }
 0xd4f   : > { %4258 = vmatprep.mubr.msk.f32.mxu0 %vm4417_vm0, %v4416_v2  ;;  %4238 = vmatpush3.msra.mxu1 %v3845_v61 }
 0xd50   : > { %4239 = vmatprep.subr.mxu1 %v4416_v2  ;;  %4251 = vmatpush3.msra.mxu0 %v3587_v29 }
 0xd51   : > { %4240 = vmatpush3.msra.mxu1 %v3844_v62  ;;  %4252 = vmatprep.subr.mxu0 %v4416_v2 }
 0xd52   : > { %4241 = vmatprep.subr.mxu1 %v4416_v2  ;;  %4253 = vmatpush3.msra.mxu0 %v3586_v26 }
 0xd53   : > { %4242 = vmatpush3.msra.mxu1 %v3843_v63  ;;  %4254 = vmatprep.subr.mxu0 %v4416_v2 }
 0xd54   : > { %4243 = vmatprep.subr.mxu1 %v4416_v2  ;;  %4255 = vmatpush3.msra.mxu0 %v3585_v30 }
 0xd55   : > { %4244 = vmatpush3.msra.mxu1 %v3842_v0  ;;  %4256 = vmatprep.subr.mxu0 %v4416_v2 }
 0xd56   : > { %4245 = vmatprep.subr.mxu1 %v4416_v2  ;;  %4257 = vmatpush3.msra.mxu0 %v3584_v31  ;;  %v3855_v2 = vld [vmem:[%s5204_s15] ss:$0 sm:$0xff] }
 0xd57   : > { %4246 = vmatpush3.msra.mxu1 %v3841_v1 }
 0xe0e   : > { %v3449_v4 = vpop.f32.mrf.mxu0 }
 0xe0f   : > { %v3450_v5 = vadd.f32 %v3838_v3, %v3449_v4 }
 0xe10   : > { %v4230_v6 = vpop.f32.mrf.mxu0 }
 0xe11   : > { %v3840_v7 = vmul.f32 -1.442695, %v3450_v5 }
 0xe13   : > { %4346 = vpow2.f32 %v3840_v7 }
 0xe20   : > { %v4347_v8 = vpop.eup %4346 }
 0xe21   : > { %v3456_v9 = vadd.f32 1.0, %v4347_v8 }
 0xe23   : > { %4348 = vrcp.f32 %v3456_v9 }
 0xe30   : > { %v4349_v11 = vpop.eup %4348 }
 0xe31   : > { %v3459_v12 = vmul.f32 %v4349_v11, %v3450_v5 }
 0xe33   : > { %4248 = vmatmul.mubr.msk.f32.vlgmr.msra.gmra.mxu1 %vm1952_vm4, %v3459_v12 }
 0xef3   : > { %v3546_v14 = vpop.f32.mrf.mxu1 }
 0xef4   : > { %v3547_v15 = vadd.f32 %v3850_v13, %v3546_v14 }
 0xef5   : > { %v4249_v16 = vpop.f32.mrf.mxu1 }
 0xef6   : > { %v3550_v17 = vmul.f32 %v3547_v15, %v3547_v15 }
 0xef8   : > { %v3551_v18 = vsel %vm566_vm1, %v3550_v17, 0.0 }
 0xef9   : > { %3552 = vadd.xlane.f32.xlu1 %v3551_v18 }
 0xf82   : > { %v3553_v10 = vpop.xlane.xlu1 %3552 }
 0xf83   : > { %v3554_v19 = vmul.f32 0.03125, %v3553_v10 }
 0xf85   : > { %v3555_v20 = vadd.f32 1e-06, %v3554_v19 }
 0xf87   : > { %4350 = vrsqrt.f32 %v3555_v20 }
 0xf94   : > { %v4351_v21 = vpop.eup %4350 }
 0xf95   : > { %v3557_v23 = vmul.f32 %v4351_v21, %v3547_v15 }
 0xf97   : > { %v3566_v24 = vmul.f32 %v3853_v22, %v3557_v23 }
 0xf99   : > { %v3567_v25 = vadd.f32 %v3566_v24, %v3366_v58 }
 0xf9b   : > { %v3568_v27 = vmul.f32 %v3567_v25, %v3567_v25 }
 0xf9d   : > { %v3569_v28 = vsel %vm566_vm1, %v3568_v27, 0.0 }
 0xf9e   : > { %3570 = vadd.xlane.f32.xlu0 %v3569_v28 }
0x1027   : > { %v3571_v32 = vpop.xlane.xlu0 %3570 }
0x1028   : > { %v3572_v33 = vmul.f32 0.03125, %v3571_v32 }
0x102a   : > { %v3573_v34 = vadd.f32 1e-06, %v3572_v33 }
0x102c   : > { %4352 = vrsqrt.f32 %v3573_v34 }
0x1039   : > { %v4353_v35 = vpop.eup %4352 }
0x103a   : > { %v3575_v37 = vmul.f32 %v4353_v35, %v3567_v25 }
0x103c   : > { %v3583_v38 = vmul.f32 %v3854_v36, %v3575_v37 }
0x103e   : > { %4259 = vmatmul.mubr.msk.f32.vlgmr.msra.gmra.mxu0 %vm566_vm1, %v3583_v38 }
0x10fe   : > { %v3664_v39 = vpop.f32.mrf.mxu0 }
0x10ff   : > { %v3665_v41 = vadd.f32 %v3855_v2, %v3664_v39 }
0x1100   : > { %v4260_v42 = vpop.f32.mrf.mxu0 }
0x1101   : > { %3669 = vst.msk [vmem:[%s512_s21] sm:$0xff] %vm3668_vm5, %v3665_v41 }
0x1102   : > { %4367 = shalt.err (!%p4364_p3)
}
0x1103   : > { %s4368_s27 = scalar_lea.hbm %s5154_s24, 128  ;;  %s4372_s21 = scalar_lea.hbm %s5205_s16, 256 }
0x1104   : > { %p4369_p4 = scmp.ne.s32.totalorder %s5154_s24, %s4368_s27  ;;  %p4373_p9 = scmp.lt.s32.totalorder %s5154_s24, %s5205_s16 }
0x1105   : > { %p4374_p10 = scmp.lt.s32.totalorder %s4372_s21, %s4368_s27 }
0x1106   : > { %p4370_p7 = pnand %p4369_p4, %p4544_p5 }
0x1107   : > { %p4375_p11 = por %p4374_p10, %p4373_p9 }
0x1108   : > { %p4371_p8 = pneg %p4370_p7 }
0x110a   : > { %p4376_p12 = pnand %p4375_p11, %p4371_p8 }
0x110c   : > { %4379 = shalt.err (!%p4376_p12)
}
0x110d   : > { %4261 = dma.vmem_to_hbm [thread:$0]  (%p4544_p5), %s3685_s28, 128, %s5154_s24, %s3671_s23  }
0x110e PF: > { %s5222_s30 = sld [smem:[#allocation7_spill]] }
0x110f   : > { %s5223_s25 = sld [smem:[#allocation5_spill]] }
0x1114   : > { %p4267_p13 = scmp.ge.s32.totalorder %s5222_s30, 2 }
0x1115   : > { %s3696_s26 = sand.u32 1, %s5223_s25  }
0x1116   : > { %p4264_p0 = pnand %p4267_p13, %p4548_p6  ;;  %s3697_s20 = scalar_lea.sflag [#allocation3], %s3696_s26 }
0x1118   : > { %p4265_p1 = pneg %p4264_p0 }
0x111a   : > { %4397 = dma.done.wait (%p4265_p1), %s3697_s20, 128  }
0x111b   : > { %4399 = vsyncadd (%p4265_p1), %s3697_s20, 4294967168  ;;  %s5225_s24 = sld [smem:[#allocation8_spill]]  ;;  %s5228_s21 = smov %s4406_s22 }
0x111c   : > { %s5226_s27 = sld [smem:[#allocation6_spill]] }
0x111d   : > { %s5227_s23 = sld [smem:[#allocation9_spill]] }
0x1121   : > { %p26_p2 = scmp.ge.s32.totalorder %s5225_s24, 4  }
0x1122   : > { %s5229_s22 = smov %s5226_s27 }
0x1123   :  { %28 = sbr.rel (!%p26_p2) target bundleno = 5 (0x5), region = 129 }
0x1128   :  { %3702 = vsyncpa [#allocation3], 1 }
0x1129   :  { %3704 = vsyncpa [#allocation3 + $0x1], 1 }

</bundles_post_ra>
